<compile_context>
chip_gen: v6e
topology: v6e:2x2x1
jax: 0.10.0
libtpu: 0.0.40
codegen_flags: <defaults>
</compile_context>

<pallas_src>
import functools

import jax
import jax.numpy as jnp
from jax import lax
from jax.experimental import pallas as pl
from jax.experimental.pallas import tpu as pltpu


def _round_up(x, m):
    return (x + m - 1) // m * m


def _gate_layout(hidden_size):
    """Lane layout of the 4 LSTM gates.

    If all four gates fit in one 128-lane block (4*H <= 128) they are packed
    side by side: gate k occupies lanes [k*H, (k+1)*H) and h/c are only H
    lanes wide.  Otherwise each gate gets its own 128-padded block.
    Returns (hw, gw, packed): h/c lane width, gate-matrix lane width, flag.
    """
    H = hidden_size
    if 4 * H <= 128:
        return H, 128, True
    hp = _round_up(H, 128)
    return hp, 4 * hp, False


# ----------------------------------------------------------------------------
# Pallas kernel: stacked LSTM over time + last-step regressor, all in VMEM.
# ----------------------------------------------------------------------------
def _lstm_ativacao_kernel(*refs, num_layers, seq_len, bt, hw, gw, packed,
                          n_seq, n_chains):
    # refs layout:
    #   x_ref,
    #   [w_ih_0, w_hh_0, b_0, ..., w_ih_{L-1}, w_hh_{L-1}, b_{L-1}],
    #   w1, b1, w2, b2,
    #   out_ref,
    #   gih_scratch, seq_scratch_0[, seq_scratch_1]
    x_ref = refs[0]
    n_lstm = 3 * num_layers
    lstm_refs = refs[1:1 + n_lstm]
    w1_ref, b1_ref, w2_ref, b2_ref = refs[1 + n_lstm:1 + n_lstm + 4]
    out_ref = refs[1 + n_lstm + 4]
    gih_ref = refs[1 + n_lstm + 5]                       # (T, BT, gw)
    seq_refs = refs[1 + n_lstm + 6:1 + n_lstm + 6 + n_seq]

    sub = bt // n_chains

    # Lane-index mask selecting the "g" (cell candidate) gate lanes.  Hoisted
    # out of every loop (JAX does not CSE broadcasts).
    if packed:
        lane = lax.broadcasted_iota(jnp.int32, (sub, gw), 1)
        is_g = jnp.logical_and(lane >= 2 * hw, lane < 3 * hw)

    h_last = jnp.zeros((bt, hw), jnp.float32)
    for layer in range(num_layers):
        w_ih_ref = lstm_refs[3 * layer]                  # (in_p, gw)
        w_hh_ref = lstm_refs[3 * layer + 1]              # (hw,   gw)
        b_ref = lstm_refs[3 * layer + 2]                 # (1,    gw)

        # ---- Whole-sequence input-to-hidden projection, bias folded in. ----
        if layer == 0:
            inp = x_ref[...]                             # (T, BT, Ip)
        else:
            inp = seq_refs[(layer - 1) % 2][...]         # (T, BT, hw)
        in_dim = inp.shape[-1]
        g_ih = (jnp.dot(inp.reshape(seq_len * bt, in_dim), w_ih_ref[...],
                        preferred_element_type=jnp.float32)
                + b_ref[...])                            # (T*BT, gw)
        gih_ref[...] = g_ih.reshape(seq_len, bt, gw)

        write_seq = layer < num_layers - 1
        dst_ref = seq_refs[layer % 2] if write_seq else None

        # ---- Recurrence: per step, one small MXU push + gate math per chain.
        def step(t, carry, _w_hh_ref=w_hh_ref, _dst_ref=dst_ref,
                 _write=write_seq):
            g_all = gih_ref[t]                           # (BT, gw)
            new_carry = []
            h_news = []
            for ci in range(n_chains):                   # independent chains
                h, c = carry[ci]
                gates = (g_all[ci * sub:(ci + 1) * sub]
                         + jnp.dot(h, _w_hh_ref[...],
                                   preferred_element_type=jnp.float32))
                if packed:
                    # One sigmoid + one tanh over the packed 128-lane gate
                    # block, then lane-aligned static slices.
                    act = jnp.where(is_g, jnp.tanh(gates),
                                    jax.nn.sigmoid(gates))
                    i_g = act[:, 0 * hw:1 * hw]
                    f_g = act[:, 1 * hw:2 * hw]
                    g_g = act[:, 2 * hw:3 * hw]
                    o_g = act[:, 3 * hw:4 * hw]
                else:
                    i_g = jax.nn.sigmoid(gates[:, 0 * hw:1 * hw])
                    f_g = jax.nn.sigmoid(gates[:, 1 * hw:2 * hw])
                    g_g = jnp.tanh(gates[:, 2 * hw:3 * hw])
                    o_g = jax.nn.sigmoid(gates[:, 3 * hw:4 * hw])
                c_new = f_g * c + i_g * g_g
                h_new = o_g * jnp.tanh(c_new)
                new_carry.append((h_new, c_new))
                h_news.append(h_new)
            if _write:                                   # top layer skips store
                _dst_ref[t] = (h_news[0] if n_chains == 1
                               else jnp.concatenate(h_news, axis=0))
            return tuple(new_carry)

        init = tuple((jnp.zeros((sub, hw), jnp.float32),
                      jnp.zeros((sub, hw), jnp.float32))
                     for _ in range(n_chains))
        # Capped partial unroll: keeps cross-step ILP without vreg spills.
        final = lax.fori_loop(0, seq_len, step, init,
                              unroll=min(8, seq_len))
        hs = [final[ci][0] for ci in range(n_chains)]
        h_last = hs[0] if n_chains == 1 else jnp.concatenate(hs, axis=0)
        # TODO(synk): nn.Dropout(p=0.2) between layers is train-only; identity in eval.

    # Regressor on out[:, -1, :] == final hidden state of the top layer.
    y = jnp.tanh(jnp.dot(h_last, w1_ref[...],
                         preferred_element_type=jnp.float32) + b1_ref[...])
    out_ref[...] = (jnp.dot(y, w2_ref[...],
                            preferred_element_type=jnp.float32) + b2_ref[...])


# ----------------------------------------------------------------------------
# One-time parameter preparation: transpose + gate-wise lane packing/padding.
# ----------------------------------------------------------------------------
def prepare_params(lstm_params, w1, b1, w2, b2, input_size, hidden_size):
    H = hidden_size
    hw, gw, _ = _gate_layout(H)
    Ip = _round_up(input_size, 128)
    O = w2.shape[0]
    Op = _round_up(O, 128)

    prepared = []
    for layer, (w_ih, w_hh, b_ih, b_hh) in enumerate(lstm_params):
        in_l = input_size if layer == 0 else H
        in_lp = Ip if layer == 0 else hw
        # (4H, in) -> (in, 4, H) -> pad gate width to hw -> (in, 4*hw) ->
        # pad to (in_lp, gw).  Padded rows/lanes are zero so padded lanes of
        # the gates / h / c provably stay inert.
        w_ih_t = jnp.asarray(w_ih, jnp.float32).T.reshape(in_l, 4, H)
        w_ih_p = jnp.pad(w_ih_t, ((0, 0), (0, 0), (0, hw - H)))
        w_ih_p = w_ih_p.reshape(in_l, 4 * hw)
        w_ih_p = jnp.pad(w_ih_p, ((0, in_lp - in_l), (0, gw - 4 * hw)))
        prepared.append(w_ih_p)

        w_hh_t = jnp.asarray(w_hh, jnp.float32).T.reshape(H, 4, H)
        w_hh_p = jnp.pad(w_hh_t, ((0, 0), (0, 0), (0, hw - H)))
        w_hh_p = w_hh_p.reshape(H, 4 * hw)
        w_hh_p = jnp.pad(w_hh_p, ((0, hw - H), (0, gw - 4 * hw)))
        prepared.append(w_hh_p)

        b = (jnp.asarray(b_ih, jnp.float32)
             + jnp.asarray(b_hh, jnp.float32)).reshape(4, H)
        b_p = jnp.pad(b, ((0, 0), (0, hw - H))).reshape(1, 4 * hw)
        b_p = jnp.pad(b_p, ((0, 0), (0, gw - 4 * hw)))
        prepared.append(b_p)

    w1_p = jnp.pad(jnp.asarray(w1, jnp.float32).T, ((0, hw - H), (0, hw - H)))
    b1_p = jnp.pad(jnp.asarray(b1, jnp.float32), (0, hw - H))[None, :]
    w2_p = jnp.pad(jnp.asarray(w2, jnp.float32).T, ((0, hw - H), (0, Op - O)))
    b2_p = jnp.pad(jnp.asarray(b2, jnp.float32), (0, Op - O))[None, :]
    prepared += [w1_p, b1_p, w2_p, b2_p]
    return prepared


# ----------------------------------------------------------------------------
# Wrapper: padding + pallas_call with a batch-parallel grid.
# ----------------------------------------------------------------------------
def lstm_ativacao_forward(x, prepared, *, input_size, hidden_size, num_layers,
                          output_size, batch_tile=128):
    B, T, I = x.shape
    assert I == input_size
    H, L, O = hidden_size, num_layers, output_size
    hw, gw, packed = _gate_layout(H)
    Ip = _round_up(I, 128)
    Op = _round_up(O, 128)

    # Batch tiling: tiny B collapses to a single grid step (BT = Bp); large B
    # uses 128-row tiles so recurrent MXU pushes have full row sets and the
    # parallel grid has >=2 steps (feeds both v7x TensorCores).
    BT = min(_round_up(B, 8), batch_tile)
    Bp = _round_up(B, BT)
    nb = Bp // BT
    n_seq = 0 if L == 1 else (1 if L == 2 else 2)
    # Two independent (h,c) chains hide dot->act->fma latency; only when each
    # sub-tile keeps >=8 sublanes.
    n_chains = 2 if BT % 16 == 0 else 1

    # Time-major, sublane-padded batch, lane-padded feature dim.
    x_tbi = jnp.transpose(x.astype(jnp.float32), (1, 0, 2))       # (T, B, I)
    x_pad = jnp.pad(x_tbi, ((0, 0), (0, Bp - B), (0, Ip - I)))    # (T, Bp, Ip)

    kernel = functools.partial(
        _lstm_ativacao_kernel,
        num_layers=L, seq_len=T, bt=BT, hw=hw, gw=gw, packed=packed,
        n_seq=n_seq, n_chains=n_chains)

    # x / out are tiled over the batch grid; parameters stay fully resident.
    # TODO(synk): mark grid-invariant parameter BlockSpecs single-buffered
    # (pipeline_mode=pl.Buffered(1)) if VMEM gets tight (v7x, 64 MiB/TC).
    in_specs = [pl.BlockSpec((T, BT, Ip), lambda b: (0, b, 0))]
    for p in prepared:
        in_specs.append(pl.BlockSpec(p.shape, lambda b, nd=p.ndim: (0,) * nd))
    out_spec = pl.BlockSpec((BT, Op), lambda b: (b, 0))

    # TODO(synk): for very large T/BT/H, chunk the time axis of the gih
    # precompute and stream the inter-layer sequence from HBM instead.
    scratch = [pltpu.VMEM((T, BT, gw), jnp.float32)]
    scratch += [pltpu.VMEM((T, BT, hw), jnp.float32)] * n_seq

    # VMEM budget derived from actual sizes (blocks/params double-buffered).
    vmem_bytes = 4 * (2 * T * BT * Ip
                      + 2 * sum(int(p.size) for p in prepared)
                      + 2 * BT * Op
                      + T * BT * gw + n_seq * T * BT * hw)
    vmem_limit = int(min(max(2 * vmem_bytes, 32 * 1024 * 1024),
                         100 * 1024 * 1024))

    flops = 0
    for l in range(L):
        in_p = Ip if l == 0 else hw
        flops += 2 * T * Bp * in_p * gw          # input->hidden (precomputed)
        flops += 2 * T * Bp * hw * gw            # hidden->hidden (recurrent)
    flops += 2 * Bp * hw * hw + 2 * Bp * hw * Op
    transcendentals = L * T * Bp * (2 * gw + hw) + Bp * hw
    bytes_accessed = 4 * (x_pad.size + sum(int(p.size) for p in prepared)
                          + Bp * Op)
    ce = pl.CostEstimate(flops=int(flops), transcendentals=int(transcendentals),
                         bytes_accessed=int(bytes_accessed))

    grid_spec = pltpu.PrefetchScalarGridSpec(
        num_scalar_prefetch=0,
        grid=(nb,),
        in_specs=in_specs,
        out_specs=out_spec,
        scratch_shapes=scratch)

    out = pl.pallas_call(
        kernel,
        out_shape=jax.ShapeDtypeStruct((Bp, Op), jnp.float32),
        grid_spec=grid_spec,
        compiler_params=pltpu.CompilerParams(
            dimension_semantics=("parallel",),
            vmem_limit_bytes=vmem_limit),
        cost_estimate=ce,
    )(x_pad, *prepared)

    return out[:B, :O]


# ----------------------------------------------------------------------------
# Pure-JAX reference (PyTorch semantics, eval mode) for correctness checking.
# ----------------------------------------------------------------------------
def reference_forward(x, lstm_params, w1, b1, w2, b2):
    B, T, _ = x.shape
    seq = x
    for (w_ih, w_hh, b_ih, b_hh) in lstm_params:
        H = w_hh.shape[1]
        h = jnp.zeros((B, H), jnp.float32)
        c = jnp.zeros((B, H), jnp.float32)
        outs = []
        for t in range(T):
            gates = seq[:, t, :] @ w_ih.T + h @ w_hh.T + b_ih + b_hh
            i, f, g, o = jnp.split(gates, 4, axis=-1)
            i = jax.nn.sigmoid(i)
            f = jax.nn.sigmoid(f)
            g = jnp.tanh(g)
            o = jax.nn.sigmoid(o)
            c = f * c + i * g
            h = o * jnp.tanh(c)
            outs.append(h)
        seq = jnp.stack(outs, axis=1)
    last = seq[:, -1, :]
    y = jnp.tanh(last @ w1.T + b1)
    return y @ w2.T + b2


# ----------------------------------------------------------------------------
# Deterministic parameter init (PyTorch-style uniform(-1/sqrt(H), 1/sqrt(H))).
# ----------------------------------------------------------------------------
def init_params(key, input_size, hidden_size, num_layers, output_size):
    k = 1.0 / jnp.sqrt(hidden_size)
    lstm_params = []
    for layer in range(num_layers):
        in_l = input_size if layer == 0 else hidden_size
        key, k1, k2, k3, k4 = jax.random.split(key, 5)
        w_ih = jax.random.uniform(k1, (4 * hidden_size, in_l), jnp.float32, -k, k)
        w_hh = jax.random.uniform(k2, (4 * hidden_size, hidden_size), jnp.float32, -k, k)
        b_ih = jax.random.uniform(k3, (4 * hidden_size,), jnp.float32, -k, k)
        b_hh = jax.random.uniform(k4, (4 * hidden_size,), jnp.float32, -k, k)
        lstm_params.append((w_ih, w_hh, b_ih, b_hh))
    key, k1, k2, k3, k4 = jax.random.split(key, 5)
    kl = 1.0 / jnp.sqrt(hidden_size)
    w1 = jax.random.uniform(k1, (hidden_size, hidden_size), jnp.float32, -kl, kl)
    b1 = jax.random.uniform(k2, (hidden_size,), jnp.float32, -kl, kl)
    w2 = jax.random.uniform(k3, (output_size, hidden_size), jnp.float32, -kl, kl)
    b2 = jax.random.uniform(k4, (output_size,), jnp.float32, -kl, kl)
    return lstm_params, w1, b1, w2, b2


if __name__ == "__main__":
    # Small shapes consistent with the module's forward: x is (batch, seq, input_size).
    B, T, I, H, L, O = 2, 8, 16, 32, 2, 4

    key = jax.random.PRNGKey(0)
    key, xk = jax.random.split(key)
    x = jax.random.normal(xk, (B, T, I), jnp.float32)

    lstm_params, w1, b1, w2, b2 = init_params(key, I, H, L, O)

    prepared = prepare_params(lstm_params, w1, b1, w2, b2, I, H)
    out = lstm_ativacao_forward(x, prepared, input_size=I, hidden_size=H,
                                num_layers=L, output_size=O)
    out = jax.block_until_ready(out)

    ref = reference_forward(x, lstm_params, w1, b1, w2, b2)
    assert out.shape == (B, O), out.shape
    assert jnp.allclose(out, ref, rtol=2e-3, atol=2e-4), (out, ref)

    print("KERNEL_OK")
</pallas_src>

<mosaic_0001>
module attributes {stable_mosaic.version = 11 : i64} {
  func.func @_lstm_ativacao_kernel(%arg0: i32, %arg1: memref<8x8x128xf32, #tpu.memory_space<vmem>>, %arg2: memref<128x128xf32, #tpu.memory_space<vmem>>, %arg3: memref<32x128xf32, #tpu.memory_space<vmem>>, %arg4: memref<1x128xf32, #tpu.memory_space<vmem>>, %arg5: memref<32x128xf32, #tpu.memory_space<vmem>>, %arg6: memref<32x128xf32, #tpu.memory_space<vmem>>, %arg7: memref<1x128xf32, #tpu.memory_space<vmem>>, %arg8: memref<32x32xf32, #tpu.memory_space<vmem>>, %arg9: memref<1x32xf32, #tpu.memory_space<vmem>>, %arg10: memref<32x128xf32, #tpu.memory_space<vmem>>, %arg11: memref<1x128xf32, #tpu.memory_space<vmem>>, %arg12: memref<8x128xf32, #tpu.memory_space<vmem>>, %arg13: memref<8x8x128xf32, #tpu.memory_space<vmem>>, %arg14: memref<8x8x32xf32, #tpu.memory_space<vmem>>) attributes {dimension_semantics = [#tpu.dimension_semantics<parallel>], iteration_bounds = array<i64: 1>, scalar_prefetch = 0 : i64, scratch_operands = 2 : i64, tpu.core_type = #tpu.core_type<tc>, window_params = [{transform_indices = @transform_0, window_bounds = array<i64: 8, 8, 128>}, {pipeline_mode = #tpu.pipeline_mode<synchronous>, transform_indices = @transform_1, window_bounds = array<i64: 128, 128>}, {pipeline_mode = #tpu.pipeline_mode<synchronous>, transform_indices = @transform_2, window_bounds = array<i64: 32, 128>}, {pipeline_mode = #tpu.pipeline_mode<synchronous>, transform_indices = @transform_3, window_bounds = array<i64: 1, 128>}, {pipeline_mode = #tpu.pipeline_mode<synchronous>, transform_indices = @transform_4, window_bounds = array<i64: 32, 128>}, {pipeline_mode = #tpu.pipeline_mode<synchronous>, transform_indices = @transform_5, window_bounds = array<i64: 32, 128>}, {pipeline_mode = #tpu.pipeline_mode<synchronous>, transform_indices = @transform_6, window_bounds = array<i64: 1, 128>}, {pipeline_mode = #tpu.pipeline_mode<synchronous>, transform_indices = @transform_7, window_bounds = array<i64: 32, 32>}, {pipeline_mode = #tpu.pipeline_mode<synchronous>, transform_indices = @transform_8, window_bounds = array<i64: 1, 32>}, {pipeline_mode = #tpu.pipeline_mode<synchronous>, transform_indices = @transform_9, window_bounds = array<i64: 32, 128>}, {pipeline_mode = #tpu.pipeline_mode<synchronous>, transform_indices = @transform_10, window_bounds = array<i64: 1, 128>}, {transform_indices = @transform_11, window_bounds = array<i64: 8, 128>}]} {
    %0 = tpu.iota {dimensions = array<i32: 1>} : vector<8x128xi32>
    %c64_i32 = arith.constant 64 : i32
    %1 = vector.broadcast %c64_i32 : i32 to vector<8x128xi32>
    %2 = arith.cmpi sge, %0, %1 : vector<8x128xi32>
    %c96_i32 = arith.constant 96 : i32
    %3 = vector.broadcast %c96_i32 : i32 to vector<8x128xi32>
    %4 = arith.cmpi slt, %0, %3 : vector<8x128xi32>
    %5 = arith.andi %2, %4 : vector<8x128xi1>
    %c0 = arith.constant 0 : index
    %c0_0 = arith.constant 0 : index
    %c0_1 = arith.constant 0 : index
    %6 = vector.load %arg1[%c0, %c0_0, %c0_1] : memref<8x8x128xf32, #tpu.memory_space<vmem>>, vector<8x8x128xf32>
    %7 = vector.shape_cast %6 : vector<8x8x128xf32> to vector<64x128xf32>
    %c0_2 = arith.constant 0 : index
    %c0_3 = arith.constant 0 : index
    %8 = vector.load %arg2[%c0_2, %c0_3] : memref<128x128xf32, #tpu.memory_space<vmem>>, vector<128x128xf32>
    %cst = arith.constant dense<0.000000e+00> : vector<64x128xf32>
    %9 = tpu.matmul %7, %8, %cst {dimension_numbers = #tpu.dot_dimension_numbers<[1], [0], [0], [1], [0, 0, 1, 1], [], []>} : vector<64x128xf32>, vector<128x128xf32>, vector<64x128xf32> -> vector<64x128xf32>
    %c0_4 = arith.constant 0 : index
    %c0_5 = arith.constant 0 : index
    %10 = vector.load %arg4[%c0_4, %c0_5] : memref<1x128xf32, #tpu.memory_space<vmem>>, vector<1x128xf32>
    %11 = vector.broadcast %10 : vector<1x128xf32> to vector<64x128xf32>
    %12 = arith.addf %9, %11 : vector<64x128xf32>
    %13 = vector.shape_cast %12 : vector<64x128xf32> to vector<8x8x128xf32>
    %c0_6 = arith.constant 0 : index
    %c0_7 = arith.constant 0 : index
    %c0_8 = arith.constant 0 : index
    %14 = vector.load %arg13[%c0_6, %c0_7, %c0_8] : memref<8x8x128xf32, #tpu.memory_space<vmem>>, vector<8x8x128xf32>
    tpu.vector_store %arg13[%c0_6, %c0_7, %c0_8], %13 {strides = array<i32>} : memref<8x8x128xf32, #tpu.memory_space<vmem>>, vector<8x8x128xf32>,
    %cst_9 = arith.constant 0.000000e+00 : f32
    %15 = vector.broadcast %cst_9 : f32 to vector<8x32xf32>
    %cst_10 = arith.constant 0.000000e+00 : f32
    %16 = vector.broadcast %cst_10 : f32 to vector<8x32xf32>
    %c0_i32 = arith.constant 0 : i32
    %17 = arith.index_cast %c0_i32 : i32 to index
    %c0_11 = arith.constant 0 : index
    %c0_12 = arith.constant 0 : index
    %18 = vector.load %arg13[%17, %c0_11, %c0_12] : memref<8x8x128xf32, #tpu.memory_space<vmem>>, vector<1x8x128xf32>
    %19 = vector.shape_cast %18 : vector<1x8x128xf32> to vector<8x128xf32>
    %c0_13 = arith.constant 0 : index
    %c0_14 = arith.constant 0 : index
    %20 = vector.load %arg3[%c0_13, %c0_14] : memref<32x128xf32, #tpu.memory_space<vmem>>, vector<32x128xf32>
    %cst_15 = arith.constant dense<0.000000e+00> : vector<8x128xf32>
    %21 = tpu.matmul %15, %20, %cst_15 {dimension_numbers = #tpu.dot_dimension_numbers<[1], [0], [0], [1], [0, 0, 1, 1], [], []>} : vector<8x32xf32>, vector<32x128xf32>, vector<8x128xf32> -> vector<8x128xf32>
    %22 = arith.addf %19, %21 : vector<8x128xf32>
    %23 = math.tanh %22 : vector<8x128xf32>
    %24 = arith.negf %22 : vector<8x128xf32>
    %25 = math.exp %24 : vector<8x128xf32>
    %cst_16 = arith.constant 1.000000e+00 : f32
    %26 = vector.broadcast %cst_16 : f32 to vector<8x128xf32>
    %27 = arith.addf %26, %25 : vector<8x128xf32>
    %28 = arith.divf %26, %27 : vector<8x128xf32>
    %29 = arith.select %5, %23, %28 : vector<8x128xi1>, vector<8x128xf32>
    %30 = vector.extract_strided_slice %29 {offsets = [0, 0], sizes = [8, 32], strides = [1, 1]} : vector<8x128xf32> to vector<8x32xf32>
    %31 = vector.extract_strided_slice %29 {offsets = [0, 32], sizes = [8, 32], strides = [1, 1]} : vector<8x128xf32> to vector<8x32xf32>
    %32 = vector.extract_strided_slice %29 {offsets = [0, 64], sizes = [8, 32], strides = [1, 1]} : vector<8x128xf32> to vector<8x32xf32>
    %33 = vector.extract_strided_slice %29 {offsets = [0, 96], sizes = [8, 32], strides = [1, 1]} : vector<8x128xf32> to vector<8x32xf32>
    %34 = arith.mulf %31, %16 : vector<8x32xf32>
    %35 = arith.mulf %30, %32 : vector<8x32xf32>
    %36 = arith.addf %34, %35 : vector<8x32xf32>
    %37 = math.tanh %36 : vector<8x32xf32>
    %38 = arith.mulf %33, %37 : vector<8x32xf32>
    %39 = arith.index_cast %c0_i32 : i32 to index
    %c0_17 = arith.constant 0 : index
    %c0_18 = arith.constant 0 : index
    %40 = vector.load %arg14[%39, %c0_17, %c0_18] : memref<8x8x32xf32, #tpu.memory_space<vmem>>, vector<1x8x32xf32>
    %41 = vector.shape_cast %40 : vector<1x8x32xf32> to vector<8x32xf32>
    %42 = vector.shape_cast %38 : vector<8x32xf32> to vector<1x8x32xf32>
    tpu.vector_store %arg14[%39, %c0_17, %c0_18], %42 {strides = array<i32>} : memref<8x8x32xf32, #tpu.memory_space<vmem>>, vector<1x8x32xf32>,
    %c1_i32 = arith.constant 1 : i32
    %43 = arith.index_cast %c1_i32 : i32 to index
    %c0_19 = arith.constant 0 : index
    %c0_20 = arith.constant 0 : index
    %44 = vector.load %arg13[%43, %c0_19, %c0_20] : memref<8x8x128xf32, #tpu.memory_space<vmem>>, vector<1x8x128xf32>
    %45 = vector.shape_cast %44 : vector<1x8x128xf32> to vector<8x128xf32>
    %c0_21 = arith.constant 0 : index
    %c0_22 = arith.constant 0 : index
    %46 = vector.load %arg3[%c0_21, %c0_22] : memref<32x128xf32, #tpu.memory_space<vmem>>, vector<32x128xf32>
    %cst_23 = arith.constant dense<0.000000e+00> : vector<8x128xf32>
    %47 = tpu.matmul %38, %46, %cst_23 {dimension_numbers = #tpu.dot_dimension_numbers<[1], [0], [0], [1], [0, 0, 1, 1], [], []>} : vector<8x32xf32>, vector<32x128xf32>, vector<8x128xf32> -> vector<8x128xf32>
    %48 = arith.addf %45, %47 : vector<8x128xf32>
    %49 = math.tanh %48 : vector<8x128xf32>
    %50 = arith.negf %48 : vector<8x128xf32>
    %51 = math.exp %50 : vector<8x128xf32>
    %cst_24 = arith.constant 1.000000e+00 : f32
    %52 = vector.broadcast %cst_24 : f32 to vector<8x128xf32>
    %53 = arith.addf %52, %51 : vector<8x128xf32>
    %54 = arith.divf %52, %53 : vector<8x128xf32>
    %55 = arith.select %5, %49, %54 : vector<8x128xi1>, vector<8x128xf32>
    %56 = vector.extract_strided_slice %55 {offsets = [0, 0], sizes = [8, 32], strides = [1, 1]} : vector<8x128xf32> to vector<8x32xf32>
    %57 = vector.extract_strided_slice %55 {offsets = [0, 32], sizes = [8, 32], strides = [1, 1]} : vector<8x128xf32> to vector<8x32xf32>
    %58 = vector.extract_strided_slice %55 {offsets = [0, 64], sizes = [8, 32], strides = [1, 1]} : vector<8x128xf32> to vector<8x32xf32>
    %59 = vector.extract_strided_slice %55 {offsets = [0, 96], sizes = [8, 32], strides = [1, 1]} : vector<8x128xf32> to vector<8x32xf32>
    %60 = arith.mulf %57, %36 : vector<8x32xf32>
    %61 = arith.mulf %56, %58 : vector<8x32xf32>
    %62 = arith.addf %60, %61 : vector<8x32xf32>
    %63 = math.tanh %62 : vector<8x32xf32>
    %64 = arith.mulf %59, %63 : vector<8x32xf32>
    %65 = arith.index_cast %c1_i32 : i32 to index
    %c0_25 = arith.constant 0 : index
    %c0_26 = arith.constant 0 : index
    %66 = vector.load %arg14[%65, %c0_25, %c0_26] : memref<8x8x32xf32, #tpu.memory_space<vmem>>, vector<1x8x32xf32>
    %67 = vector.shape_cast %66 : vector<1x8x32xf32> to vector<8x32xf32>
    %68 = vector.shape_cast %64 : vector<8x32xf32> to vector<1x8x32xf32>
    tpu.vector_store %arg14[%65, %c0_25, %c0_26], %68 {strides = array<i32>} : memref<8x8x32xf32, #tpu.memory_space<vmem>>, vector<1x8x32xf32>,
    %c2_i32 = arith.constant 2 : i32
    %69 = arith.index_cast %c2_i32 : i32 to index
    %c0_27 = arith.constant 0 : index
    %c0_28 = arith.constant 0 : index
    %70 = vector.load %arg13[%69, %c0_27, %c0_28] : memref<8x8x128xf32, #tpu.memory_space<vmem>>, vector<1x8x128xf32>
    %71 = vector.shape_cast %70 : vector<1x8x128xf32> to vector<8x128xf32>
    %c0_29 = arith.constant 0 : index
    %c0_30 = arith.constant 0 : index
    %72 = vector.load %arg3[%c0_29, %c0_30] : memref<32x128xf32, #tpu.memory_space<vmem>>, vector<32x128xf32>
    %cst_31 = arith.constant dense<0.000000e+00> : vector<8x128xf32>
    %73 = tpu.matmul %64, %72, %cst_31 {dimension_numbers = #tpu.dot_dimension_numbers<[1], [0], [0], [1], [0, 0, 1, 1], [], []>} : vector<8x32xf32>, vector<32x128xf32>, vector<8x128xf32> -> vector<8x128xf32>
    %74 = arith.addf %71, %73 : vector<8x128xf32>
    %75 = math.tanh %74 : vector<8x128xf32>
    %76 = arith.negf %74 : vector<8x128xf32>
    %77 = math.exp %76 : vector<8x128xf32>
    %cst_32 = arith.constant 1.000000e+00 : f32
    %78 = vector.broadcast %cst_32 : f32 to vector<8x128xf32>
    %79 = arith.addf %78, %77 : vector<8x128xf32>
    %80 = arith.divf %78, %79 : vector<8x128xf32>
    %81 = arith.select %5, %75, %80 : vector<8x128xi1>, vector<8x128xf32>
    %82 = vector.extract_strided_slice %81 {offsets = [0, 0], sizes = [8, 32], strides = [1, 1]} : vector<8x128xf32> to vector<8x32xf32>
    %83 = vector.extract_strided_slice %81 {offsets = [0, 32], sizes = [8, 32], strides = [1, 1]} : vector<8x128xf32> to vector<8x32xf32>
    %84 = vector.extract_strided_slice %81 {offsets = [0, 64], sizes = [8, 32], strides = [1, 1]} : vector<8x128xf32> to vector<8x32xf32>
    %85 = vector.extract_strided_slice %81 {offsets = [0, 96], sizes = [8, 32], strides = [1, 1]} : vector<8x128xf32> to vector<8x32xf32>
    %86 = arith.mulf %83, %62 : vector<8x32xf32>
    %87 = arith.mulf %82, %84 : vector<8x32xf32>
    %88 = arith.addf %86, %87 : vector<8x32xf32>
    %89 = math.tanh %88 : vector<8x32xf32>
    %90 = arith.mulf %85, %89 : vector<8x32xf32>
    %91 = arith.index_cast %c2_i32 : i32 to index
    %c0_33 = arith.constant 0 : index
    %c0_34 = arith.constant 0 : index
    %92 = vector.load %arg14[%91, %c0_33, %c0_34] : memref<8x8x32xf32, #tpu.memory_space<vmem>>, vector<1x8x32xf32>
    %93 = vector.shape_cast %92 : vector<1x8x32xf32> to vector<8x32xf32>
    %94 = vector.shape_cast %90 : vector<8x32xf32> to vector<1x8x32xf32>
    tpu.vector_store %arg14[%91, %c0_33, %c0_34], %94 {strides = array<i32>} : memref<8x8x32xf32, #tpu.memory_space<vmem>>, vector<1x8x32xf32>,
    %c3_i32 = arith.constant 3 : i32
    %95 = arith.index_cast %c3_i32 : i32 to index
    %c0_35 = arith.constant 0 : index
    %c0_36 = arith.constant 0 : index
    %96 = vector.load %arg13[%95, %c0_35, %c0_36] : memref<8x8x128xf32, #tpu.memory_space<vmem>>, vector<1x8x128xf32>
    %97 = vector.shape_cast %96 : vector<1x8x128xf32> to vector<8x128xf32>
    %c0_37 = arith.constant 0 : index
    %c0_38 = arith.constant 0 : index
    %98 = vector.load %arg3[%c0_37, %c0_38] : memref<32x128xf32, #tpu.memory_space<vmem>>, vector<32x128xf32>
    %cst_39 = arith.constant dense<0.000000e+00> : vector<8x128xf32>
    %99 = tpu.matmul %90, %98, %cst_39 {dimension_numbers = #tpu.dot_dimension_numbers<[1], [0], [0], [1], [0, 0, 1, 1], [], []>} : vector<8x32xf32>, vector<32x128xf32>, vector<8x128xf32> -> vector<8x128xf32>
    %100 = arith.addf %97, %99 : vector<8x128xf32>
    %101 = math.tanh %100 : vector<8x128xf32>
    %102 = arith.negf %100 : vector<8x128xf32>
    %103 = math.exp %102 : vector<8x128xf32>
    %cst_40 = arith.constant 1.000000e+00 : f32
    %104 = vector.broadcast %cst_40 : f32 to vector<8x128xf32>
    %105 = arith.addf %104, %103 : vector<8x128xf32>
    %106 = arith.divf %104, %105 : vector<8x128xf32>
    %107 = arith.select %5, %101, %106 : vector<8x128xi1>, vector<8x128xf32>
    %108 = vector.extract_strided_slice %107 {offsets = [0, 0], sizes = [8, 32], strides = [1, 1]} : vector<8x128xf32> to vector<8x32xf32>
    %109 = vector.extract_strided_slice %107 {offsets = [0, 32], sizes = [8, 32], strides = [1, 1]} : vector<8x128xf32> to vector<8x32xf32>
    %110 = vector.extract_strided_slice %107 {offsets = [0, 64], sizes = [8, 32], strides = [1, 1]} : vector<8x128xf32> to vector<8x32xf32>
    %111 = vector.extract_strided_slice %107 {offsets = [0, 96], sizes = [8, 32], strides = [1, 1]} : vector<8x128xf32> to vector<8x32xf32>
    %112 = arith.mulf %109, %88 : vector<8x32xf32>
    %113 = arith.mulf %108, %110 : vector<8x32xf32>
    %114 = arith.addf %112, %113 : vector<8x32xf32>
    %115 = math.tanh %114 : vector<8x32xf32>
    %116 = arith.mulf %111, %115 : vector<8x32xf32>
    %117 = arith.index_cast %c3_i32 : i32 to index
    %c0_41 = arith.constant 0 : index
    %c0_42 = arith.constant 0 : index
    %118 = vector.load %arg14[%117, %c0_41, %c0_42] : memref<8x8x32xf32, #tpu.memory_space<vmem>>, vector<1x8x32xf32>
    %119 = vector.shape_cast %118 : vector<1x8x32xf32> to vector<8x32xf32>
    %120 = vector.shape_cast %116 : vector<8x32xf32> to vector<1x8x32xf32>
    tpu.vector_store %arg14[%117, %c0_41, %c0_42], %120 {strides = array<i32>} : memref<8x8x32xf32, #tpu.memory_space<vmem>>, vector<1x8x32xf32>,
    %c4_i32 = arith.constant 4 : i32
    %121 = arith.index_cast %c4_i32 : i32 to index
    %c0_43 = arith.constant 0 : index
    %c0_44 = arith.constant 0 : index
    %122 = vector.load %arg13[%121, %c0_43, %c0_44] : memref<8x8x128xf32, #tpu.memory_space<vmem>>, vector<1x8x128xf32>
    %123 = vector.shape_cast %122 : vector<1x8x128xf32> to vector<8x128xf32>
    %c0_45 = arith.constant 0 : index
    %c0_46 = arith.constant 0 : index
    %124 = vector.load %arg3[%c0_45, %c0_46] : memref<32x128xf32, #tpu.memory_space<vmem>>, vector<32x128xf32>
    %cst_47 = arith.constant dense<0.000000e+00> : vector<8x128xf32>
    %125 = tpu.matmul %116, %124, %cst_47 {dimension_numbers = #tpu.dot_dimension_numbers<[1], [0], [0], [1], [0, 0, 1, 1], [], []>} : vector<8x32xf32>, vector<32x128xf32>, vector<8x128xf32> -> vector<8x128xf32>
    %126 = arith.addf %123, %125 : vector<8x128xf32>
    %127 = math.tanh %126 : vector<8x128xf32>
    %128 = arith.negf %126 : vector<8x128xf32>
    %129 = math.exp %128 : vector<8x128xf32>
    %cst_48 = arith.constant 1.000000e+00 : f32
    %130 = vector.broadcast %cst_48 : f32 to vector<8x128xf32>
    %131 = arith.addf %130, %129 : vector<8x128xf32>
    %132 = arith.divf %130, %131 : vector<8x128xf32>
    %133 = arith.select %5, %127, %132 : vector<8x128xi1>, vector<8x128xf32>
    %134 = vector.extract_strided_slice %133 {offsets = [0, 0], sizes = [8, 32], strides = [1, 1]} : vector<8x128xf32> to vector<8x32xf32>
    %135 = vector.extract_strided_slice %133 {offsets = [0, 32], sizes = [8, 32], strides = [1, 1]} : vector<8x128xf32> to vector<8x32xf32>
    %136 = vector.extract_strided_slice %133 {offsets = [0, 64], sizes = [8, 32], strides = [1, 1]} : vector<8x128xf32> to vector<8x32xf32>
    %137 = vector.extract_strided_slice %133 {offsets = [0, 96], sizes = [8, 32], strides = [1, 1]} : vector<8x128xf32> to vector<8x32xf32>
    %138 = arith.mulf %135, %114 : vector<8x32xf32>
    %139 = arith.mulf %134, %136 : vector<8x32xf32>
    %140 = arith.addf %138, %139 : vector<8x32xf32>
    %141 = math.tanh %140 : vector<8x32xf32>
    %142 = arith.mulf %137, %141 : vector<8x32xf32>
    %143 = arith.index_cast %c4_i32 : i32 to index
    %c0_49 = arith.constant 0 : index
    %c0_50 = arith.constant 0 : index
    %144 = vector.load %arg14[%143, %c0_49, %c0_50] : memref<8x8x32xf32, #tpu.memory_space<vmem>>, vector<1x8x32xf32>
    %145 = vector.shape_cast %144 : vector<1x8x32xf32> to vector<8x32xf32>
    %146 = vector.shape_cast %142 : vector<8x32xf32> to vector<1x8x32xf32>
    tpu.vector_store %arg14[%143, %c0_49, %c0_50], %146 {strides = array<i32>} : memref<8x8x32xf32, #tpu.memory_space<vmem>>, vector<1x8x32xf32>,
    %c5_i32 = arith.constant 5 : i32
    %147 = arith.index_cast %c5_i32 : i32 to index
    %c0_51 = arith.constant 0 : index
    %c0_52 = arith.constant 0 : index
    %148 = vector.load %arg13[%147, %c0_51, %c0_52] : memref<8x8x128xf32, #tpu.memory_space<vmem>>, vector<1x8x128xf32>
    %149 = vector.shape_cast %148 : vector<1x8x128xf32> to vector<8x128xf32>
    %c0_53 = arith.constant 0 : index
    %c0_54 = arith.constant 0 : index
    %150 = vector.load %arg3[%c0_53, %c0_54] : memref<32x128xf32, #tpu.memory_space<vmem>>, vector<32x128xf32>
    %cst_55 = arith.constant dense<0.000000e+00> : vector<8x128xf32>
    %151 = tpu.matmul %142, %150, %cst_55 {dimension_numbers = #tpu.dot_dimension_numbers<[1], [0], [0], [1], [0, 0, 1, 1], [], []>} : vector<8x32xf32>, vector<32x128xf32>, vector<8x128xf32> -> vector<8x128xf32>
    %152 = arith.addf %149, %151 : vector<8x128xf32>
    %153 = math.tanh %152 : vector<8x128xf32>
    %154 = arith.negf %152 : vector<8x128xf32>
    %155 = math.exp %154 : vector<8x128xf32>
    %cst_56 = arith.constant 1.000000e+00 : f32
    %156 = vector.broadcast %cst_56 : f32 to vector<8x128xf32>
    %157 = arith.addf %156, %155 : vector<8x128xf32>
    %158 = arith.divf %156, %157 : vector<8x128xf32>
    %159 = arith.select %5, %153, %158 : vector<8x128xi1>, vector<8x128xf32>
    %160 = vector.extract_strided_slice %159 {offsets = [0, 0], sizes = [8, 32], strides = [1, 1]} : vector<8x128xf32> to vector<8x32xf32>
    %161 = vector.extract_strided_slice %159 {offsets = [0, 32], sizes = [8, 32], strides = [1, 1]} : vector<8x128xf32> to vector<8x32xf32>
    %162 = vector.extract_strided_slice %159 {offsets = [0, 64], sizes = [8, 32], strides = [1, 1]} : vector<8x128xf32> to vector<8x32xf32>
    %163 = vector.extract_strided_slice %159 {offsets = [0, 96], sizes = [8, 32], strides = [1, 1]} : vector<8x128xf32> to vector<8x32xf32>
    %164 = arith.mulf %161, %140 : vector<8x32xf32>
    %165 = arith.mulf %160, %162 : vector<8x32xf32>
    %166 = arith.addf %164, %165 : vector<8x32xf32>
    %167 = math.tanh %166 : vector<8x32xf32>
    %168 = arith.mulf %163, %167 : vector<8x32xf32>
    %169 = arith.index_cast %c5_i32 : i32 to index
    %c0_57 = arith.constant 0 : index
    %c0_58 = arith.constant 0 : index
    %170 = vector.load %arg14[%169, %c0_57, %c0_58] : memref<8x8x32xf32, #tpu.memory_space<vmem>>, vector<1x8x32xf32>
    %171 = vector.shape_cast %170 : vector<1x8x32xf32> to vector<8x32xf32>
    %172 = vector.shape_cast %168 : vector<8x32xf32> to vector<1x8x32xf32>
    tpu.vector_store %arg14[%169, %c0_57, %c0_58], %172 {strides = array<i32>} : memref<8x8x32xf32, #tpu.memory_space<vmem>>, vector<1x8x32xf32>,
    %c6_i32 = arith.constant 6 : i32
    %173 = arith.index_cast %c6_i32 : i32 to index
    %c0_59 = arith.constant 0 : index
    %c0_60 = arith.constant 0 : index
    %174 = vector.load %arg13[%173, %c0_59, %c0_60] : memref<8x8x128xf32, #tpu.memory_space<vmem>>, vector<1x8x128xf32>
    %175 = vector.shape_cast %174 : vector<1x8x128xf32> to vector<8x128xf32>
    %c0_61 = arith.constant 0 : index
    %c0_62 = arith.constant 0 : index
    %176 = vector.load %arg3[%c0_61, %c0_62] : memref<32x128xf32, #tpu.memory_space<vmem>>, vector<32x128xf32>
    %cst_63 = arith.constant dense<0.000000e+00> : vector<8x128xf32>
    %177 = tpu.matmul %168, %176, %cst_63 {dimension_numbers = #tpu.dot_dimension_numbers<[1], [0], [0], [1], [0, 0, 1, 1], [], []>} : vector<8x32xf32>, vector<32x128xf32>, vector<8x128xf32> -> vector<8x128xf32>
    %178 = arith.addf %175, %177 : vector<8x128xf32>
    %179 = math.tanh %178 : vector<8x128xf32>
    %180 = arith.negf %178 : vector<8x128xf32>
    %181 = math.exp %180 : vector<8x128xf32>
    %cst_64 = arith.constant 1.000000e+00 : f32
    %182 = vector.broadcast %cst_64 : f32 to vector<8x128xf32>
    %183 = arith.addf %182, %181 : vector<8x128xf32>
    %184 = arith.divf %182, %183 : vector<8x128xf32>
    %185 = arith.select %5, %179, %184 : vector<8x128xi1>, vector<8x128xf32>
    %186 = vector.extract_strided_slice %185 {offsets = [0, 0], sizes = [8, 32], strides = [1, 1]} : vector<8x128xf32> to vector<8x32xf32>
    %187 = vector.extract_strided_slice %185 {offsets = [0, 32], sizes = [8, 32], strides = [1, 1]} : vector<8x128xf32> to vector<8x32xf32>
    %188 = vector.extract_strided_slice %185 {offsets = [0, 64], sizes = [8, 32], strides = [1, 1]} : vector<8x128xf32> to vector<8x32xf32>
    %189 = vector.extract_strided_slice %185 {offsets = [0, 96], sizes = [8, 32], strides = [1, 1]} : vector<8x128xf32> to vector<8x32xf32>
    %190 = arith.mulf %187, %166 : vector<8x32xf32>
    %191 = arith.mulf %186, %188 : vector<8x32xf32>
    %192 = arith.addf %190, %191 : vector<8x32xf32>
    %193 = math.tanh %192 : vector<8x32xf32>
    %194 = arith.mulf %189, %193 : vector<8x32xf32>
    %195 = arith.index_cast %c6_i32 : i32 to index
    %c0_65 = arith.constant 0 : index
    %c0_66 = arith.constant 0 : index
    %196 = vector.load %arg14[%195, %c0_65, %c0_66] : memref<8x8x32xf32, #tpu.memory_space<vmem>>, vector<1x8x32xf32>
    %197 = vector.shape_cast %196 : vector<1x8x32xf32> to vector<8x32xf32>
    %198 = vector.shape_cast %194 : vector<8x32xf32> to vector<1x8x32xf32>
    tpu.vector_store %arg14[%195, %c0_65, %c0_66], %198 {strides = array<i32>} : memref<8x8x32xf32, #tpu.memory_space<vmem>>, vector<1x8x32xf32>,
    %c7_i32 = arith.constant 7 : i32
    %199 = arith.index_cast %c7_i32 : i32 to index
    %c0_67 = arith.constant 0 : index
    %c0_68 = arith.constant 0 : index
    %200 = vector.load %arg13[%199, %c0_67, %c0_68] : memref<8x8x128xf32, #tpu.memory_space<vmem>>, vector<1x8x128xf32>
    %201 = vector.shape_cast %200 : vector<1x8x128xf32> to vector<8x128xf32>
    %c0_69 = arith.constant 0 : index
    %c0_70 = arith.constant 0 : index
    %202 = vector.load %arg3[%c0_69, %c0_70] : memref<32x128xf32, #tpu.memory_space<vmem>>, vector<32x128xf32>
    %cst_71 = arith.constant dense<0.000000e+00> : vector<8x128xf32>
    %203 = tpu.matmul %194, %202, %cst_71 {dimension_numbers = #tpu.dot_dimension_numbers<[1], [0], [0], [1], [0, 0, 1, 1], [], []>} : vector<8x32xf32>, vector<32x128xf32>, vector<8x128xf32> -> vector<8x128xf32>
    %204 = arith.addf %201, %203 : vector<8x128xf32>
    %205 = math.tanh %204 : vector<8x128xf32>
    %206 = arith.negf %204 : vector<8x128xf32>
    %207 = math.exp %206 : vector<8x128xf32>
    %cst_72 = arith.constant 1.000000e+00 : f32
    %208 = vector.broadcast %cst_72 : f32 to vector<8x128xf32>
    %209 = arith.addf %208, %207 : vector<8x128xf32>
    %210 = arith.divf %208, %209 : vector<8x128xf32>
    %211 = arith.select %5, %205, %210 : vector<8x128xi1>, vector<8x128xf32>
    %212 = vector.extract_strided_slice %211 {offsets = [0, 0], sizes = [8, 32], strides = [1, 1]} : vector<8x128xf32> to vector<8x32xf32>
    %213 = vector.extract_strided_slice %211 {offsets = [0, 32], sizes = [8, 32], strides = [1, 1]} : vector<8x128xf32> to vector<8x32xf32>
    %214 = vector.extract_strided_slice %211 {offsets = [0, 64], sizes = [8, 32], strides = [1, 1]} : vector<8x128xf32> to vector<8x32xf32>
    %215 = vector.extract_strided_slice %211 {offsets = [0, 96], sizes = [8, 32], strides = [1, 1]} : vector<8x128xf32> to vector<8x32xf32>
    %216 = arith.mulf %213, %192 : vector<8x32xf32>
    %217 = arith.mulf %212, %214 : vector<8x32xf32>
    %218 = arith.addf %216, %217 : vector<8x32xf32>
    %219 = math.tanh %218 : vector<8x32xf32>
    %220 = arith.mulf %215, %219 : vector<8x32xf32>
    %221 = arith.index_cast %c7_i32 : i32 to index
    %c0_73 = arith.constant 0 : index
    %c0_74 = arith.constant 0 : index
    %222 = vector.load %arg14[%221, %c0_73, %c0_74] : memref<8x8x32xf32, #tpu.memory_space<vmem>>, vector<1x8x32xf32>
    %223 = vector.shape_cast %222 : vector<1x8x32xf32> to vector<8x32xf32>
    %224 = vector.shape_cast %220 : vector<8x32xf32> to vector<1x8x32xf32>
    tpu.vector_store %arg14[%221, %c0_73, %c0_74], %224 {strides = array<i32>} : memref<8x8x32xf32, #tpu.memory_space<vmem>>, vector<1x8x32xf32>,
    %c8_i32 = arith.constant 8 : i32
    %c0_75 = arith.constant 0 : index
    %c0_76 = arith.constant 0 : index
    %c0_77 = arith.constant 0 : index
    %225 = vector.load %arg14[%c0_75, %c0_76, %c0_77] : memref<8x8x32xf32, #tpu.memory_space<vmem>>, vector<8x8x32xf32>
    %226 = vector.shape_cast %225 : vector<8x8x32xf32> to vector<64x32xf32>
    %c0_78 = arith.constant 0 : index
    %c0_79 = arith.constant 0 : index
    %227 = vector.load %arg5[%c0_78, %c0_79] : memref<32x128xf32, #tpu.memory_space<vmem>>, vector<32x128xf32>
    %cst_80 = arith.constant dense<0.000000e+00> : vector<64x128xf32>
    %228 = tpu.matmul %226, %227, %cst_80 {dimension_numbers = #tpu.dot_dimension_numbers<[1], [0], [0], [1], [0, 0, 1, 1], [], []>} : vector<64x32xf32>, vector<32x128xf32>, vector<64x128xf32> -> vector<64x128xf32>
    %c0_81 = arith.constant 0 : index
    %c0_82 = arith.constant 0 : index
    %229 = vector.load %arg7[%c0_81, %c0_82] : memref<1x128xf32, #tpu.memory_space<vmem>>, vector<1x128xf32>
    %230 = vector.broadcast %229 : vector<1x128xf32> to vector<64x128xf32>
    %231 = arith.addf %228, %230 : vector<64x128xf32>
    %232 = vector.shape_cast %231 : vector<64x128xf32> to vector<8x8x128xf32>
    %c0_83 = arith.constant 0 : index
    %c0_84 = arith.constant 0 : index
    %c0_85 = arith.constant 0 : index
    %233 = vector.load %arg13[%c0_83, %c0_84, %c0_85] : memref<8x8x128xf32, #tpu.memory_space<vmem>>, vector<8x8x128xf32>
    tpu.vector_store %arg13[%c0_83, %c0_84, %c0_85], %232 {strides = array<i32>} : memref<8x8x128xf32, #tpu.memory_space<vmem>>, vector<8x8x128xf32>,
    %cst_86 = arith.constant 0.000000e+00 : f32
    %234 = vector.broadcast %cst_86 : f32 to vector<8x32xf32>
    %cst_87 = arith.constant 0.000000e+00 : f32
    %235 = vector.broadcast %cst_87 : f32 to vector<8x32xf32>
    %c0_i32_88 = arith.constant 0 : i32
    %236 = arith.index_cast %c0_i32_88 : i32 to index
    %c0_89 = arith.constant 0 : index
    %c0_90 = arith.constant 0 : index
    %237 = vector.load %arg13[%236, %c0_89, %c0_90] : memref<8x8x128xf32, #tpu.memory_space<vmem>>, vector<1x8x128xf32>
    %238 = vector.shape_cast %237 : vector<1x8x128xf32> to vector<8x128xf32>
    %c0_91 = arith.constant 0 : index
    %c0_92 = arith.constant 0 : index
    %239 = vector.load %arg6[%c0_91, %c0_92] : memref<32x128xf32, #tpu.memory_space<vmem>>, vector<32x128xf32>
    %cst_93 = arith.constant dense<0.000000e+00> : vector<8x128xf32>
    %240 = tpu.matmul %234, %239, %cst_93 {dimension_numbers = #tpu.dot_dimension_numbers<[1], [0], [0], [1], [0, 0, 1, 1], [], []>} : vector<8x32xf32>, vector<32x128xf32>, vector<8x128xf32> -> vector<8x128xf32>
    %241 = arith.addf %238, %240 : vector<8x128xf32>
    %242 = math.tanh %241 : vector<8x128xf32>
    %243 = arith.negf %241 : vector<8x128xf32>
    %244 = math.exp %243 : vector<8x128xf32>
    %cst_94 = arith.constant 1.000000e+00 : f32
    %245 = vector.broadcast %cst_94 : f32 to vector<8x128xf32>
    %246 = arith.addf %245, %244 : vector<8x128xf32>
    %247 = arith.divf %245, %246 : vector<8x128xf32>
    %248 = arith.select %5, %242, %247 : vector<8x128xi1>, vector<8x128xf32>
    %249 = vector.extract_strided_slice %248 {offsets = [0, 0], sizes = [8, 32], strides = [1, 1]} : vector<8x128xf32> to vector<8x32xf32>
    %250 = vector.extract_strided_slice %248 {offsets = [0, 32], sizes = [8, 32], strides = [1, 1]} : vector<8x128xf32> to vector<8x32xf32>
    %251 = vector.extract_strided_slice %248 {offsets = [0, 64], sizes = [8, 32], strides = [1, 1]} : vector<8x128xf32> to vector<8x32xf32>
    %252 = vector.extract_strided_slice %248 {offsets = [0, 96], sizes = [8, 32], strides = [1, 1]} : vector<8x128xf32> to vector<8x32xf32>
    %253 = arith.mulf %250, %235 : vector<8x32xf32>
    %254 = arith.mulf %249, %251 : vector<8x32xf32>
    %255 = arith.addf %253, %254 : vector<8x32xf32>
    %256 = math.tanh %255 : vector<8x32xf32>
    %257 = arith.mulf %252, %256 : vector<8x32xf32>
    %c1_i32_95 = arith.constant 1 : i32
    %258 = arith.index_cast %c1_i32_95 : i32 to index
    %c0_96 = arith.constant 0 : index
    %c0_97 = arith.constant 0 : index
    %259 = vector.load %arg13[%258, %c0_96, %c0_97] : memref<8x8x128xf32, #tpu.memory_space<vmem>>, vector<1x8x128xf32>
    %260 = vector.shape_cast %259 : vector<1x8x128xf32> to vector<8x128xf32>
    %c0_98 = arith.constant 0 : index
    %c0_99 = arith.constant 0 : index
    %261 = vector.load %arg6[%c0_98, %c0_99] : memref<32x128xf32, #tpu.memory_space<vmem>>, vector<32x128xf32>
    %cst_100 = arith.constant dense<0.000000e+00> : vector<8x128xf32>
    %262 = tpu.matmul %257, %261, %cst_100 {dimension_numbers = #tpu.dot_dimension_numbers<[1], [0], [0], [1], [0, 0, 1, 1], [], []>} : vector<8x32xf32>, vector<32x128xf32>, vector<8x128xf32> -> vector<8x128xf32>
    %263 = arith.addf %260, %262 : vector<8x128xf32>
    %264 = math.tanh %263 : vector<8x128xf32>
    %265 = arith.negf %263 : vector<8x128xf32>
    %266 = math.exp %265 : vector<8x128xf32>
    %cst_101 = arith.constant 1.000000e+00 : f32
    %267 = vector.broadcast %cst_101 : f32 to vector<8x128xf32>
    %268 = arith.addf %267, %266 : vector<8x128xf32>
    %269 = arith.divf %267, %268 : vector<8x128xf32>
    %270 = arith.select %5, %264, %269 : vector<8x128xi1>, vector<8x128xf32>
    %271 = vector.extract_strided_slice %270 {offsets = [0, 0], sizes = [8, 32], strides = [1, 1]} : vector<8x128xf32> to vector<8x32xf32>
    %272 = vector.extract_strided_slice %270 {offsets = [0, 32], sizes = [8, 32], strides = [1, 1]} : vector<8x128xf32> to vector<8x32xf32>
    %273 = vector.extract_strided_slice %270 {offsets = [0, 64], sizes = [8, 32], strides = [1, 1]} : vector<8x128xf32> to vector<8x32xf32>
    %274 = vector.extract_strided_slice %270 {offsets = [0, 96], sizes = [8, 32], strides = [1, 1]} : vector<8x128xf32> to vector<8x32xf32>
    %275 = arith.mulf %272, %255 : vector<8x32xf32>
    %276 = arith.mulf %271, %273 : vector<8x32xf32>
    %277 = arith.addf %275, %276 : vector<8x32xf32>
    %278 = math.tanh %277 : vector<8x32xf32>
    %279 = arith.mulf %274, %278 : vector<8x32xf32>
    %c2_i32_102 = arith.constant 2 : i32
    %280 = arith.index_cast %c2_i32_102 : i32 to index
    %c0_103 = arith.constant 0 : index
    %c0_104 = arith.constant 0 : index
    %281 = vector.load %arg13[%280, %c0_103, %c0_104] : memref<8x8x128xf32, #tpu.memory_space<vmem>>, vector<1x8x128xf32>
    %282 = vector.shape_cast %281 : vector<1x8x128xf32> to vector<8x128xf32>
    %c0_105 = arith.constant 0 : index
    %c0_106 = arith.constant 0 : index
    %283 = vector.load %arg6[%c0_105, %c0_106] : memref<32x128xf32, #tpu.memory_space<vmem>>, vector<32x128xf32>
    %cst_107 = arith.constant dense<0.000000e+00> : vector<8x128xf32>
    %284 = tpu.matmul %279, %283, %cst_107 {dimension_numbers = #tpu.dot_dimension_numbers<[1], [0], [0], [1], [0, 0, 1, 1], [], []>} : vector<8x32xf32>, vector<32x128xf32>, vector<8x128xf32> -> vector<8x128xf32>
    %285 = arith.addf %282, %284 : vector<8x128xf32>
    %286 = math.tanh %285 : vector<8x128xf32>
    %287 = arith.negf %285 : vector<8x128xf32>
    %288 = math.exp %287 : vector<8x128xf32>
    %cst_108 = arith.constant 1.000000e+00 : f32
    %289 = vector.broadcast %cst_108 : f32 to vector<8x128xf32>
    %290 = arith.addf %289, %288 : vector<8x128xf32>
    %291 = arith.divf %289, %290 : vector<8x128xf32>
    %292 = arith.select %5, %286, %291 : vector<8x128xi1>, vector<8x128xf32>
    %293 = vector.extract_strided_slice %292 {offsets = [0, 0], sizes = [8, 32], strides = [1, 1]} : vector<8x128xf32> to vector<8x32xf32>
    %294 = vector.extract_strided_slice %292 {offsets = [0, 32], sizes = [8, 32], strides = [1, 1]} : vector<8x128xf32> to vector<8x32xf32>
    %295 = vector.extract_strided_slice %292 {offsets = [0, 64], sizes = [8, 32], strides = [1, 1]} : vector<8x128xf32> to vector<8x32xf32>
    %296 = vector.extract_strided_slice %292 {offsets = [0, 96], sizes = [8, 32], strides = [1, 1]} : vector<8x128xf32> to vector<8x32xf32>
    %297 = arith.mulf %294, %277 : vector<8x32xf32>
    %298 = arith.mulf %293, %295 : vector<8x32xf32>
    %299 = arith.addf %297, %298 : vector<8x32xf32>
    %300 = math.tanh %299 : vector<8x32xf32>
    %301 = arith.mulf %296, %300 : vector<8x32xf32>
    %c3_i32_109 = arith.constant 3 : i32
    %302 = arith.index_cast %c3_i32_109 : i32 to index
    %c0_110 = arith.constant 0 : index
    %c0_111 = arith.constant 0 : index
    %303 = vector.load %arg13[%302, %c0_110, %c0_111] : memref<8x8x128xf32, #tpu.memory_space<vmem>>, vector<1x8x128xf32>
    %304 = vector.shape_cast %303 : vector<1x8x128xf32> to vector<8x128xf32>
    %c0_112 = arith.constant 0 : index
    %c0_113 = arith.constant 0 : index
    %305 = vector.load %arg6[%c0_112, %c0_113] : memref<32x128xf32, #tpu.memory_space<vmem>>, vector<32x128xf32>
    %cst_114 = arith.constant dense<0.000000e+00> : vector<8x128xf32>
    %306 = tpu.matmul %301, %305, %cst_114 {dimension_numbers = #tpu.dot_dimension_numbers<[1], [0], [0], [1], [0, 0, 1, 1], [], []>} : vector<8x32xf32>, vector<32x128xf32>, vector<8x128xf32> -> vector<8x128xf32>
    %307 = arith.addf %304, %306 : vector<8x128xf32>
    %308 = math.tanh %307 : vector<8x128xf32>
    %309 = arith.negf %307 : vector<8x128xf32>
    %310 = math.exp %309 : vector<8x128xf32>
    %cst_115 = arith.constant 1.000000e+00 : f32
    %311 = vector.broadcast %cst_115 : f32 to vector<8x128xf32>
    %312 = arith.addf %311, %310 : vector<8x128xf32>
    %313 = arith.divf %311, %312 : vector<8x128xf32>
    %314 = arith.select %5, %308, %313 : vector<8x128xi1>, vector<8x128xf32>
    %315 = vector.extract_strided_slice %314 {offsets = [0, 0], sizes = [8, 32], strides = [1, 1]} : vector<8x128xf32> to vector<8x32xf32>
    %316 = vector.extract_strided_slice %314 {offsets = [0, 32], sizes = [8, 32], strides = [1, 1]} : vector<8x128xf32> to vector<8x32xf32>
    %317 = vector.extract_strided_slice %314 {offsets = [0, 64], sizes = [8, 32], strides = [1, 1]} : vector<8x128xf32> to vector<8x32xf32>
    %318 = vector.extract_strided_slice %314 {offsets = [0, 96], sizes = [8, 32], strides = [1, 1]} : vector<8x128xf32> to vector<8x32xf32>
    %319 = arith.mulf %316, %299 : vector<8x32xf32>
    %320 = arith.mulf %315, %317 : vector<8x32xf32>
    %321 = arith.addf %319, %320 : vector<8x32xf32>
    %322 = math.tanh %321 : vector<8x32xf32>
    %323 = arith.mulf %318, %322 : vector<8x32xf32>
    %c4_i32_116 = arith.constant 4 : i32
    %324 = arith.index_cast %c4_i32_116 : i32 to index
    %c0_117 = arith.constant 0 : index
    %c0_118 = arith.constant 0 : index
    %325 = vector.load %arg13[%324, %c0_117, %c0_118] : memref<8x8x128xf32, #tpu.memory_space<vmem>>, vector<1x8x128xf32>
    %326 = vector.shape_cast %325 : vector<1x8x128xf32> to vector<8x128xf32>
    %c0_119 = arith.constant 0 : index
    %c0_120 = arith.constant 0 : index
    %327 = vector.load %arg6[%c0_119, %c0_120] : memref<32x128xf32, #tpu.memory_space<vmem>>, vector<32x128xf32>
    %cst_121 = arith.constant dense<0.000000e+00> : vector<8x128xf32>
    %328 = tpu.matmul %323, %327, %cst_121 {dimension_numbers = #tpu.dot_dimension_numbers<[1], [0], [0], [1], [0, 0, 1, 1], [], []>} : vector<8x32xf32>, vector<32x128xf32>, vector<8x128xf32> -> vector<8x128xf32>
    %329 = arith.addf %326, %328 : vector<8x128xf32>
    %330 = math.tanh %329 : vector<8x128xf32>
    %331 = arith.negf %329 : vector<8x128xf32>
    %332 = math.exp %331 : vector<8x128xf32>
    %cst_122 = arith.constant 1.000000e+00 : f32
    %333 = vector.broadcast %cst_122 : f32 to vector<8x128xf32>
    %334 = arith.addf %333, %332 : vector<8x128xf32>
    %335 = arith.divf %333, %334 : vector<8x128xf32>
    %336 = arith.select %5, %330, %335 : vector<8x128xi1>, vector<8x128xf32>
    %337 = vector.extract_strided_slice %336 {offsets = [0, 0], sizes = [8, 32], strides = [1, 1]} : vector<8x128xf32> to vector<8x32xf32>
    %338 = vector.extract_strided_slice %336 {offsets = [0, 32], sizes = [8, 32], strides = [1, 1]} : vector<8x128xf32> to vector<8x32xf32>
    %339 = vector.extract_strided_slice %336 {offsets = [0, 64], sizes = [8, 32], strides = [1, 1]} : vector<8x128xf32> to vector<8x32xf32>
    %340 = vector.extract_strided_slice %336 {offsets = [0, 96], sizes = [8, 32], strides = [1, 1]} : vector<8x128xf32> to vector<8x32xf32>
    %341 = arith.mulf %338, %321 : vector<8x32xf32>
    %342 = arith.mulf %337, %339 : vector<8x32xf32>
    %343 = arith.addf %341, %342 : vector<8x32xf32>
    %344 = math.tanh %343 : vector<8x32xf32>
    %345 = arith.mulf %340, %344 : vector<8x32xf32>
    %c5_i32_123 = arith.constant 5 : i32
    %346 = arith.index_cast %c5_i32_123 : i32 to index
    %c0_124 = arith.constant 0 : index
    %c0_125 = arith.constant 0 : index
    %347 = vector.load %arg13[%346, %c0_124, %c0_125] : memref<8x8x128xf32, #tpu.memory_space<vmem>>, vector<1x8x128xf32>
    %348 = vector.shape_cast %347 : vector<1x8x128xf32> to vector<8x128xf32>
    %c0_126 = arith.constant 0 : index
    %c0_127 = arith.constant 0 : index
    %349 = vector.load %arg6[%c0_126, %c0_127] : memref<32x128xf32, #tpu.memory_space<vmem>>, vector<32x128xf32>
    %cst_128 = arith.constant dense<0.000000e+00> : vector<8x128xf32>
    %350 = tpu.matmul %345, %349, %cst_128 {dimension_numbers = #tpu.dot_dimension_numbers<[1], [0], [0], [1], [0, 0, 1, 1], [], []>} : vector<8x32xf32>, vector<32x128xf32>, vector<8x128xf32> -> vector<8x128xf32>
    %351 = arith.addf %348, %350 : vector<8x128xf32>
    %352 = math.tanh %351 : vector<8x128xf32>
    %353 = arith.negf %351 : vector<8x128xf32>
    %354 = math.exp %353 : vector<8x128xf32>
    %cst_129 = arith.constant 1.000000e+00 : f32
    %355 = vector.broadcast %cst_129 : f32 to vector<8x128xf32>
    %356 = arith.addf %355, %354 : vector<8x128xf32>
    %357 = arith.divf %355, %356 : vector<8x128xf32>
    %358 = arith.select %5, %352, %357 : vector<8x128xi1>, vector<8x128xf32>
    %359 = vector.extract_strided_slice %358 {offsets = [0, 0], sizes = [8, 32], strides = [1, 1]} : vector<8x128xf32> to vector<8x32xf32>
    %360 = vector.extract_strided_slice %358 {offsets = [0, 32], sizes = [8, 32], strides = [1, 1]} : vector<8x128xf32> to vector<8x32xf32>
    %361 = vector.extract_strided_slice %358 {offsets = [0, 64], sizes = [8, 32], strides = [1, 1]} : vector<8x128xf32> to vector<8x32xf32>
    %362 = vector.extract_strided_slice %358 {offsets = [0, 96], sizes = [8, 32], strides = [1, 1]} : vector<8x128xf32> to vector<8x32xf32>
    %363 = arith.mulf %360, %343 : vector<8x32xf32>
    %364 = arith.mulf %359, %361 : vector<8x32xf32>
    %365 = arith.addf %363, %364 : vector<8x32xf32>
    %366 = math.tanh %365 : vector<8x32xf32>
    %367 = arith.mulf %362, %366 : vector<8x32xf32>
    %c6_i32_130 = arith.constant 6 : i32
    %368 = arith.index_cast %c6_i32_130 : i32 to index
    %c0_131 = arith.constant 0 : index
    %c0_132 = arith.constant 0 : index
    %369 = vector.load %arg13[%368, %c0_131, %c0_132] : memref<8x8x128xf32, #tpu.memory_space<vmem>>, vector<1x8x128xf32>
    %370 = vector.shape_cast %369 : vector<1x8x128xf32> to vector<8x128xf32>
    %c0_133 = arith.constant 0 : index
    %c0_134 = arith.constant 0 : index
    %371 = vector.load %arg6[%c0_133, %c0_134] : memref<32x128xf32, #tpu.memory_space<vmem>>, vector<32x128xf32>
    %cst_135 = arith.constant dense<0.000000e+00> : vector<8x128xf32>
    %372 = tpu.matmul %367, %371, %cst_135 {dimension_numbers = #tpu.dot_dimension_numbers<[1], [0], [0], [1], [0, 0, 1, 1], [], []>} : vector<8x32xf32>, vector<32x128xf32>, vector<8x128xf32> -> vector<8x128xf32>
    %373 = arith.addf %370, %372 : vector<8x128xf32>
    %374 = math.tanh %373 : vector<8x128xf32>
    %375 = arith.negf %373 : vector<8x128xf32>
    %376 = math.exp %375 : vector<8x128xf32>
    %cst_136 = arith.constant 1.000000e+00 : f32
    %377 = vector.broadcast %cst_136 : f32 to vector<8x128xf32>
    %378 = arith.addf %377, %376 : vector<8x128xf32>
    %379 = arith.divf %377, %378 : vector<8x128xf32>
    %380 = arith.select %5, %374, %379 : vector<8x128xi1>, vector<8x128xf32>
    %381 = vector.extract_strided_slice %380 {offsets = [0, 0], sizes = [8, 32], strides = [1, 1]} : vector<8x128xf32> to vector<8x32xf32>
    %382 = vector.extract_strided_slice %380 {offsets = [0, 32], sizes = [8, 32], strides = [1, 1]} : vector<8x128xf32> to vector<8x32xf32>
    %383 = vector.extract_strided_slice %380 {offsets = [0, 64], sizes = [8, 32], strides = [1, 1]} : vector<8x128xf32> to vector<8x32xf32>
    %384 = vector.extract_strided_slice %380 {offsets = [0, 96], sizes = [8, 32], strides = [1, 1]} : vector<8x128xf32> to vector<8x32xf32>
    %385 = arith.mulf %382, %365 : vector<8x32xf32>
    %386 = arith.mulf %381, %383 : vector<8x32xf32>
    %387 = arith.addf %385, %386 : vector<8x32xf32>
    %388 = math.tanh %387 : vector<8x32xf32>
    %389 = arith.mulf %384, %388 : vector<8x32xf32>
    %c7_i32_137 = arith.constant 7 : i32
    %390 = arith.index_cast %c7_i32_137 : i32 to index
    %c0_138 = arith.constant 0 : index
    %c0_139 = arith.constant 0 : index
    %391 = vector.load %arg13[%390, %c0_138, %c0_139] : memref<8x8x128xf32, #tpu.memory_space<vmem>>, vector<1x8x128xf32>
    %392 = vector.shape_cast %391 : vector<1x8x128xf32> to vector<8x128xf32>
    %c0_140 = arith.constant 0 : index
    %c0_141 = arith.constant 0 : index
    %393 = vector.load %arg6[%c0_140, %c0_141] : memref<32x128xf32, #tpu.memory_space<vmem>>, vector<32x128xf32>
    %cst_142 = arith.constant dense<0.000000e+00> : vector<8x128xf32>
    %394 = tpu.matmul %389, %393, %cst_142 {dimension_numbers = #tpu.dot_dimension_numbers<[1], [0], [0], [1], [0, 0, 1, 1], [], []>} : vector<8x32xf32>, vector<32x128xf32>, vector<8x128xf32> -> vector<8x128xf32>
    %395 = arith.addf %392, %394 : vector<8x128xf32>
    %396 = math.tanh %395 : vector<8x128xf32>
    %397 = arith.negf %395 : vector<8x128xf32>
    %398 = math.exp %397 : vector<8x128xf32>
    %cst_143 = arith.constant 1.000000e+00 : f32
    %399 = vector.broadcast %cst_143 : f32 to vector<8x128xf32>
    %400 = arith.addf %399, %398 : vector<8x128xf32>
    %401 = arith.divf %399, %400 : vector<8x128xf32>
    %402 = arith.select %5, %396, %401 : vector<8x128xi1>, vector<8x128xf32>
    %403 = vector.extract_strided_slice %402 {offsets = [0, 0], sizes = [8, 32], strides = [1, 1]} : vector<8x128xf32> to vector<8x32xf32>
    %404 = vector.extract_strided_slice %402 {offsets = [0, 32], sizes = [8, 32], strides = [1, 1]} : vector<8x128xf32> to vector<8x32xf32>
    %405 = vector.extract_strided_slice %402 {offsets = [0, 64], sizes = [8, 32], strides = [1, 1]} : vector<8x128xf32> to vector<8x32xf32>
    %406 = vector.extract_strided_slice %402 {offsets = [0, 96], sizes = [8, 32], strides = [1, 1]} : vector<8x128xf32> to vector<8x32xf32>
    %407 = arith.mulf %404, %387 : vector<8x32xf32>
    %408 = arith.mulf %403, %405 : vector<8x32xf32>
    %409 = arith.addf %407, %408 : vector<8x32xf32>
    %410 = math.tanh %409 : vector<8x32xf32>
    %411 = arith.mulf %406, %410 : vector<8x32xf32>
    %c8_i32_144 = arith.constant 8 : i32
    %c0_145 = arith.constant 0 : index
    %c0_146 = arith.constant 0 : index
    %412 = vector.load %arg8[%c0_145, %c0_146] : memref<32x32xf32, #tpu.memory_space<vmem>>, vector<32x32xf32>
    %cst_147 = arith.constant dense<0.000000e+00> : vector<8x32xf32>
    %413 = tpu.matmul %411, %412, %cst_147 {dimension_numbers = #tpu.dot_dimension_numbers<[1], [0], [0], [1], [0, 0, 1, 1], [], []>} : vector<8x32xf32>, vector<32x32xf32>, vector<8x32xf32> -> vector<8x32xf32>
    %c0_148 = arith.constant 0 : index
    %c0_149 = arith.constant 0 : index
    %414 = vector.load %arg9[%c0_148, %c0_149] : memref<1x32xf32, #tpu.memory_space<vmem>>, vector<1x32xf32>
    %415 = vector.broadcast %414 : vector<1x32xf32> to vector<8x32xf32>
    %416 = arith.addf %413, %415 : vector<8x32xf32>
    %417 = math.tanh %416 : vector<8x32xf32>
    %c0_150 = arith.constant 0 : index
    %c0_151 = arith.constant 0 : index
    %418 = vector.load %arg10[%c0_150, %c0_151] : memref<32x128xf32, #tpu.memory_space<vmem>>, vector<32x128xf32>
    %cst_152 = arith.constant dense<0.000000e+00> : vector<8x128xf32>
    %419 = tpu.matmul %417, %418, %cst_152 {dimension_numbers = #tpu.dot_dimension_numbers<[1], [0], [0], [1], [0, 0, 1, 1], [], []>} : vector<8x32xf32>, vector<32x128xf32>, vector<8x128xf32> -> vector<8x128xf32>
    %c0_153 = arith.constant 0 : index
    %c0_154 = arith.constant 0 : index
    %420 = vector.load %arg11[%c0_153, %c0_154] : memref<1x128xf32, #tpu.memory_space<vmem>>, vector<1x128xf32>
    %421 = vector.broadcast %420 : vector<1x128xf32> to vector<8x128xf32>
    %422 = arith.addf %419, %421 : vector<8x128xf32>
    %c0_155 = arith.constant 0 : index
    %c0_156 = arith.constant 0 : index
    %423 = vector.load %arg12[%c0_155, %c0_156] : memref<8x128xf32, #tpu.memory_space<vmem>>, vector<8x128xf32>
    tpu.vector_store %arg12[%c0_155, %c0_156], %422 {strides = array<i32>} : memref<8x128xf32, #tpu.memory_space<vmem>>, vector<8x128xf32>,
    return
  }
  func.func @transform_0(%arg0: i32) -> (i32, i32, i32) {
    %c0_i32 = arith.constant 0 : i32
    %c0_i32_0 = arith.constant 0 : i32
    %c0_i32_1 = arith.constant 0 : i32
    return %c0_i32, %arg0, %c0_i32_0 : i32, i32, i32
  }
  func.func @transform_1(%arg0: i32) -> (i32, i32) {
    %c0_i32 = arith.constant 0 : i32
    %c0_i32_0 = arith.constant 0 : i32
    %c0_i32_1 = arith.constant 0 : i32
    return %c0_i32, %c0_i32_0 : i32, i32
  }
  func.func @transform_2(%arg0: i32) -> (i32, i32) {
    %c0_i32 = arith.constant 0 : i32
    %c0_i32_0 = arith.constant 0 : i32
    %c0_i32_1 = arith.constant 0 : i32
    return %c0_i32, %c0_i32_0 : i32, i32
  }
  func.func @transform_3(%arg0: i32) -> (i32, i32) {
    %c0_i32 = arith.constant 0 : i32
    %c0_i32_0 = arith.constant 0 : i32
    %c0_i32_1 = arith.constant 0 : i32
    return %c0_i32, %c0_i32_0 : i32, i32
  }
  func.func @transform_4(%arg0: i32) -> (i32, i32) {
    %c0_i32 = arith.constant 0 : i32
    %c0_i32_0 = arith.constant 0 : i32
    %c0_i32_1 = arith.constant 0 : i32
    return %c0_i32, %c0_i32_0 : i32, i32
  }
  func.func @transform_5(%arg0: i32) -> (i32, i32) {
    %c0_i32 = arith.constant 0 : i32
    %c0_i32_0 = arith.constant 0 : i32
    %c0_i32_1 = arith.constant 0 : i32
    return %c0_i32, %c0_i32_0 : i32, i32
  }
  func.func @transform_6(%arg0: i32) -> (i32, i32) {
    %c0_i32 = arith.constant 0 : i32
    %c0_i32_0 = arith.constant 0 : i32
    %c0_i32_1 = arith.constant 0 : i32
    return %c0_i32, %c0_i32_0 : i32, i32
  }
  func.func @transform_7(%arg0: i32) -> (i32, i32) {
    %c0_i32 = arith.constant 0 : i32
    %c0_i32_0 = arith.constant 0 : i32
    %c0_i32_1 = arith.constant 0 : i32
    return %c0_i32, %c0_i32_0 : i32, i32
  }
  func.func @transform_8(%arg0: i32) -> (i32, i32) {
    %c0_i32 = arith.constant 0 : i32
    %c0_i32_0 = arith.constant 0 : i32
    %c0_i32_1 = arith.constant 0 : i32
    return %c0_i32, %c0_i32_0 : i32, i32
  }
  func.func @transform_9(%arg0: i32) -> (i32, i32) {
    %c0_i32 = arith.constant 0 : i32
    %c0_i32_0 = arith.constant 0 : i32
    %c0_i32_1 = arith.constant 0 : i32
    return %c0_i32, %c0_i32_0 : i32, i32
  }
  func.func @transform_10(%arg0: i32) -> (i32, i32) {
    %c0_i32 = arith.constant 0 : i32
    %c0_i32_0 = arith.constant 0 : i32
    %c0_i32_1 = arith.constant 0 : i32
    return %c0_i32, %c0_i32_0 : i32, i32
  }
  func.func @transform_11(%arg0: i32) -> (i32, i32) {
    %c0_i32 = arith.constant 0 : i32
    %c0_i32_0 = arith.constant 0 : i32
    return %arg0, %c0_i32 : i32, i32
  }
}

</mosaic_0001>

<bundles_post_ra>
// kernel: tpu_custom_call.1
= control target key start
LH: loop header
LB: loop body
LE: loop exit
PB: predicated region body
PF: predicated region fallthrough
CT: control target
= control target key end

     0   :  { %16 = vsyncpa [#allocation5], 0  ;;  %s3565_s0 = inlined_call_operand.hbm [shape: f32[8,8,128], index: 0, kind: input, shape index: {}]   ;;  %s3566_s1 = inlined_call_operand.hbm [shape: f32[128,128], index: 1, kind: input, shape index: {}]   ;;  %s3567_s2 = inlined_call_operand.hbm [shape: f32[32,128], index: 2, kind: input, shape index: {}]   ;;  %s3568_s3 = inlined_call_operand.vmem [shape: f32[1,128], index: 3, kind: input, shape index: {}]   ;;  %s3569_s4 = inlined_call_operand.hbm [shape: f32[32,128], index: 4, kind: input, shape index: {}]   ;;  %s3570_s5 = inlined_call_operand.hbm [shape: f32[32,128], index: 5, kind: input, shape index: {}]   ;;  %s3571_s6 = inlined_call_operand.vmem [shape: f32[1,128], index: 6, kind: input, shape index: {}]   ;;  %s3572_s7 = inlined_call_operand.hbm [shape: f32[32,32], index: 7, kind: input, shape index: {}]   ;;  %s3573_s8 = inlined_call_operand.vmem [shape: f32[1,32], index: 8, kind: input, shape index: {}]   ;;  %s3574_s9 = inlined_call_operand.hbm [shape: f32[32,128], index: 9, kind: input, shape index: {}]   ;;  %s3575_s10 = inlined_call_operand.vmem [shape: f32[1,128], index: 10, kind: input, shape index: {}]   ;;  %s3576_s11 = inlined_call_operand.hbm [shape: f32[8,128], index: 11, kind: output, shape index: {}]  }
   0x1   :  { %17 = vsyncpa [#allocation8], 0 }
   0x2   :  { %18 = vsyncpa [#allocation11], 0 }
   0x3   :  { %19 = vsyncpa [#allocation14], 0 }
   0x4   :  { %20 = vsyncpa [#allocation6], 0  ;;  %s3070_s17 = smov [#allocation7]   ;;  %s3071_s19 = smov [#allocation10]  }
   0x5   :  { %s38_s18 = sshll.u32 %s3070_s17, 4  ;;  %s64_s20 = sshll.u32 %s3071_s19, 4  ;;  %s39_s18 = int_to_ptr.vmem [resolvable:$true] %s38_s18  ;;  %s65_s20 = int_to_ptr.vmem [resolvable:$true] %s64_s20 }
   0x6   :  { %s2908_s21 = scalar_lea.vmem %s39_s18, 2048  ;;  %p2913_p1 = scmp.lt.s32.totalorder %s39_s18, %s39_s18 }
   0x7   :  { %p2909_p0 = scmp.ne.s32.totalorder %s39_s18, %s2908_s21  ;;  %p2914_p2 = scmp.lt.s32.totalorder %s2908_s21, %s2908_s21 }
   0x9   :  { %p2915_p3 = por %p2914_p2, %p2913_p1 }
   0xb   :  { %p2916_p4 = pnand %p2915_p3, %p2909_p0 }
   0xd   :  { %2919 = shalt.err (!%p2916_p4)
}
   0xe   :  { %s3072_s22 = smov 128   ;;  %s3073_s23 = smov 8  }
   0xf   :  { %44 = dma.hbm_to_vmem [thread:$0]  %s3566_s1, 2048, %s39_s18, [#allocation8], %s3072_s22, %s3072_s22, %s3073_s23  }
  0x10   :  { %s2928_s26 = scalar_lea.vmem %s65_s20, 512  ;;  %p2933_p6 = scmp.lt.s32.totalorder %s65_s20, %s65_s20 }
  0x11   :  { %p2929_p5 = scmp.ne.s32.totalorder %s65_s20, %s2928_s26  ;;  %p2934_p7 = scmp.lt.s32.totalorder %s2928_s26, %s2928_s26 }
  0x13   :  { %p2935_p8 = por %p2934_p7, %p2933_p6 }
  0x15   :  { %p2936_p9 = pnand %p2935_p8, %p2929_p5 }
  0x17   :  { %2939 = shalt.err (!%p2936_p9)
}
  0x18   :  { %70 = dma.hbm_to_vmem [thread:$0]  %s3569_s4, 512, %s65_s20, [#allocation11], %s3072_s22, %s3072_s22, %s3073_s23  }
  0x19   :  { %s3074_s29 = smov [#allocation13]   ;;  %s3075_s12 = smov [#allocation4]  }
  0x1a   :  { %s90_s30 = sshll.u32 %s3074_s29, 4  ;;  %s26_s13 = sshll.u32 %s3075_s12, 4  ;;  %s91_s30 = int_to_ptr.vmem [resolvable:$true] %s90_s30  ;;  %s27_s13 = int_to_ptr.vmem [resolvable:$true] %s26_s13 }
  0x1b   :  { %s2948_s1 = scalar_lea.vmem %s91_s30, 512  ;;  %p2953_p11 = scmp.lt.s32.totalorder %s91_s30, %s91_s30 }
  0x1c   :  { %p2949_p10 = scmp.ne.s32.totalorder %s91_s30, %s2948_s1  ;;  %p2954_p12 = scmp.lt.s32.totalorder %s2948_s1, %s2948_s1 }
  0x1e   :  { %p2955_p13 = por %p2954_p12, %p2953_p11 }
  0x20   :  { %p2956_p0 = pnand %p2955_p13, %p2949_p10 }
  0x22   :  { %2959 = shalt.err (!%p2956_p0)
}
  0x23   :  { %96 = dma.hbm_to_vmem [thread:$0]  %s3572_s7, 512, %s91_s30, [#allocation14], %s3072_s22, %s3072_s22, %s3073_s23  }
  0x24   :  { %s2968_s4 = scalar_lea.vmem %s27_s13, 1024  ;;  %p2973_p2 = scmp.lt.s32.totalorder %s27_s13, %s27_s13 }
  0x25   :  { %p2969_p1 = scmp.ne.s32.totalorder %s27_s13, %s2968_s4  ;;  %p2974_p3 = scmp.lt.s32.totalorder %s2968_s4, %s2968_s4 }
  0x27   :  { %p2975_p4 = por %p2974_p3, %p2973_p2 }
  0x29   :  { %p2976_p5 = pnand %p2975_p4, %p2969_p1 }
  0x2b   :  { %2979 = shalt.err (!%p2976_p5)
}
  0x2c   :  { %32 = dma.hbm_to_vmem [thread:$0]  %s3565_s0, 1024, %s27_s13, [#allocation5], %s3072_s22, %s3072_s22, %s3073_s23  }
  0x2d   :  { %s3076_s18 = smov [#allocation9]   ;;  %s3077_s20 = smov [#allocation12]  }
  0x2e   :  { %s50_s19 = sshll.u32 %s3076_s18, 4  ;;  %s76_s21 = sshll.u32 %s3077_s20, 4  ;;  %s51_s19 = int_to_ptr.vmem [resolvable:$true] %s50_s19  ;;  %s77_s21 = int_to_ptr.vmem [resolvable:$true] %s76_s21 }
  0x2f   :  { %s2988_s7 = scalar_lea.vmem %s51_s19, 512  ;;  %p2993_p7 = scmp.lt.s32.totalorder %s51_s19, %s51_s19 }
  0x30   :  { %p2989_p6 = scmp.ne.s32.totalorder %s51_s19, %s2988_s7  ;;  %p2994_p8 = scmp.lt.s32.totalorder %s2988_s7, %s2988_s7 }
  0x32   :  { %p2995_p9 = por %p2994_p8, %p2993_p7 }
  0x34   :  { %p2996_p10 = pnand %p2995_p9, %p2989_p6 }
  0x36   :  { %2999 = shalt.err (!%p2996_p10)
}
  0x37   :  { %56 = dma.hbm_to_vmem [thread:$0]  %s3567_s2, 512, %s51_s19, [#allocation8], %s3072_s22, %s3072_s22, %s3073_s23  }
  0x38   :  { %s3008_s0 = scalar_lea.vmem %s77_s21, 512  ;;  %p3013_p12 = scmp.lt.s32.totalorder %s77_s21, %s77_s21 }
  0x39   :  { %p3009_p11 = scmp.ne.s32.totalorder %s77_s21, %s3008_s0  ;;  %p3014_p13 = scmp.lt.s32.totalorder %s3008_s0, %s3008_s0 }
  0x3b   :  { %p3015_p0 = por %p3014_p13, %p3013_p12 }
  0x3d   :  { %p3016_p1 = pnand %p3015_p0, %p3009_p11 }
  0x3f   :  { %3019 = shalt.err (!%p3016_p1)
}
  0x40   :  { %82 = dma.hbm_to_vmem [thread:$0]  %s3570_s5, 512, %s77_s21, [#allocation11], %s3072_s22, %s3072_s22, %s3073_s23  }
  0x41   :  { %s3078_s28 = smov [#allocation15]  }
  0x42   :  { %s104_s29 = sshll.u32 %s3078_s28, 4  ;;  %s105_s29 = int_to_ptr.vmem [resolvable:$true] %s104_s29 }
  0x43   :  { %s3028_s30 = scalar_lea.vmem %s105_s29, 512  ;;  %p3033_p3 = scmp.lt.s32.totalorder %s105_s29, %s105_s29 }
  0x44   :  { %p3029_p2 = scmp.ne.s32.totalorder %s105_s29, %s3028_s30  ;;  %p3034_p4 = scmp.lt.s32.totalorder %s3028_s30, %s3028_s30 }
  0x46   :  { %p3035_p5 = por %p3034_p4, %p3033_p3 }
  0x48   :  { %p3036_p6 = pnand %p3035_p5, %p3029_p2 }
  0x4a   :  { %3039 = shalt.err (!%p3036_p6)
}
  0x4b   :  { %110 = dma.hbm_to_vmem [thread:$0]  %s3574_s9, 512, %s105_s29, [#allocation14], %s3072_s22, %s3072_s22, %s3073_s23  }
  0x4c   :  { %3060 = dma.done.wait [#allocation5], 1024  }
  0x4d   :  { %3061 = vsyncadd [#allocation5], 4294966272 }
  0x4e   :  { %3062 = dma.done.wait [#allocation8], 2560  }
  0x4f   :  { %3063 = vsyncadd [#allocation8], 4294964736 }
  0x50   :  { %3064 = dma.done.wait [#allocation11], 1024  }
  0x51   :  { %3065 = vsyncadd [#allocation11], 4294966272 }
  0x52   :  { %3066 = dma.done.wait [#allocation14], 1024  }
  0x53   :  { %3067 = vsyncadd [#allocation14], 4294966272  ;;  %v3079_v0 = vmov 0.0   ;;  %vm3080_vm0 = vmmov 0   ;;  %v162_v1 = vld [vmem:[#allocation7 + $0x78] sm:$0xff]  ;;  %v161_v2 = vld [vmem:[#allocation7 + $0x70] sm:$0xff]  ;;  %v134_v33 = vlaneseq }
  0x54   :  { %2538 = vmatprep.subr.mxu1 %v3079_v0  ;;  %2546 = vmatprep.mubr.msk.f32.mxu1 %vm3080_vm0, %v3079_v0  ;;  %v160_v3 = vld [vmem:[#allocation7 + $0x68] sm:$0xff]  ;;  %v159_v4 = vld [vmem:[#allocation7 + $0x60] sm:$0xff]  ;;  %v3189_v5 = vld [vmem:[#allocation9 + $0x18] sm:$0xff]  ;;  %s3082_s22 = smov 32   ;;  %vm288_vm4 = vcmask 261120   ;;  %s3083_s4 = smov [#allocation16]  }
  0x55   :  { %2494 = vmatprep.subr.mxu0 %v162_v1  ;;  %2539 = vmatpush3.msra.mxu1 %v3189_v5  ;;  %v3192_v6 = vld [vmem:[#allocation9 + $0x10] sm:$0xff]  ;;  %v158_v7 = vld [vmem:[#allocation7 + $0x58] sm:$0xff]  ;;  %v139_v8 = vld [vmem:[#allocation4] sm:$0xff]  ;;  %v135_v34 = vand.u32 127, %v134_v33  ;;  %s2312_s16 = sshll.u32 %s3083_s4, 4  ;;  %s2313_s16 = int_to_ptr.vmem [resolvable:$true] %s2312_s16 }
  0x56   :  { %2495 = vmatpush3.msra.mxu0 %v162_v1  ;;  %2540 = vmatprep.subr.mxu1 %v3079_v0  ;;  %v3196_v9 = vld [vmem:[#allocation9 + $0x8] sm:$0xff]  ;;  %v157_v10 = vld [vmem:[#allocation7 + $0x50] sm:$0xff]  ;;  %v3199_v11 = vld [vmem:[#allocation9] sm:$0xff]  ;;  %s3040_s17 = scalar_lea.vmem %s2313_s16, 128  ;;  %p3045_p8 = scmp.lt.s32.totalorder %s2313_s16, %s2313_s16 }
  0x57   :  { %2496 = vmatprep.subr.mxu0 %v161_v2  ;;  %2541 = vmatpush3.msra.mxu1 %v3192_v6  ;;  %v156_v12 = vld [vmem:[#allocation7 + $0x48] sm:$0xff]  ;;  %v155_v13 = vld [vmem:[#allocation7 + $0x40] sm:$0xff]  ;;  %v154_v14 = vld [vmem:[#allocation7 + $0x38] sm:$0xff]  ;;  %vm136_vm1 = vcmp.ge.s32.totalorder %v135_v34, 64  ;;  %vm137_vm2 = vcmp.lt.s32.totalorder %v135_v34, 96  ;;  %p3041_p7 = scmp.ne.s32.totalorder %s2313_s16, %s3040_s17  ;;  %p3046_p9 = scmp.lt.s32.totalorder %s3040_s17, %s3040_s17 }
  0x58   :  { %2497 = vmatpush3.msra.mxu0 %v161_v2  ;;  %2542 = vmatprep.subr.mxu1 %v3079_v0  ;;  %v153_v15 = vld [vmem:[#allocation7 + $0x30] sm:$0xff]  ;;  %v152_v16 = vld [vmem:[#allocation7 + $0x28] sm:$0xff]  ;;  %v151_v17 = vld [vmem:[#allocation7 + $0x20] sm:$0xff] }
  0x59   :  { %2498 = vmatprep.subr.mxu0 %v160_v3  ;;  %2526 = vmatprep.mubr.f32.mxu0 %v139_v8  ;;  %v150_v18 = vld [vmem:[#allocation7 + $0x18] sm:$0xff]  ;;  %v149_v19 = vld [vmem:[#allocation7 + $0x10] sm:$0xff]  ;;  %v148_v20 = vld [vmem:[#allocation7 + $0x8] sm:$0xff]  ;;  %p3047_p10 = por %p3046_p9, %p3045_p8 }
  0x5a   :  { %2499 = vmatpush3.msra.mxu0 %v160_v3  ;;  %2543 = vmatpush3.msra.mxu1 %v3196_v9  ;;  %v147_v21 = vld [vmem:[#allocation7] sm:$0xff]  ;;  %v140_v22 = vld [vmem:[#allocation4 + $0x8] sm:$0xff]  ;;  %vm3231_vm3 = vmand %vm136_vm1, %vm137_vm2 }
  0x5b   :  { %2500 = vmatprep.subr.mxu0 %v159_v4  ;;  %2544 = vmatprep.subr.mxu1 %v3079_v0  ;;  %v3228_v26 = vld [vmem:[%s3568_s3] ss:$0 sm:$0xff]  ;;  %s3081_s3 = smov 64   ;;  %v141_v63 = vld [vmem:[#allocation4 + $0x10] sm:$0xff]  ;;  %v142_v1 = vld [vmem:[#allocation4 + $0x18] sm:$0xff]  ;;  %p3048_p11 = pnand %p3047_p10, %p3041_p7 }
  0x5c   :  { %2501 = vmatpush3.msra.mxu0 %v159_v4  ;;  %2545 = vmatpush3.msra.mxu1 %v3199_v11  ;;  %v2134_v35 = vld [vmem:[#allocation13] sm:$0xff] }
  0x5d   :  { %2502 = vmatprep.subr.mxu0 %v158_v7  ;;  %2547 = vmatmul.mubr.f32.vlgmr.msra.gmra.mxu1 %v3079_v0 }
  0x5e   :  { %2503 = vmatpush3.msra.mxu0 %v158_v7  ;;  %2549 = vmatprep.subr.mxu1 %v3079_v0 }
  0x5f   :  { %2504 = vmatprep.subr.mxu0 %v157_v10  ;;  %2550 = vmatpush3.msra.mxu1 %v3189_v5 }
  0x60   :  { %2505 = vmatpush3.msra.mxu0 %v157_v10  ;;  %2551 = vmatprep.subr.mxu1 %v3079_v0 }
  0x61   :  { %2506 = vmatprep.subr.mxu0 %v156_v12  ;;  %2552 = vmatpush3.msra.mxu1 %v3192_v6 }
  0x62   :  { %2507 = vmatpush3.msra.mxu0 %v156_v12  ;;  %2553 = vmatprep.subr.mxu1 %v3079_v0 }
  0x63   :  { %2508 = vmatprep.subr.mxu0 %v155_v13  ;;  %2554 = vmatpush3.msra.mxu1 %v3196_v9 }
  0x64   :  { %2509 = vmatpush3.msra.mxu0 %v155_v13  ;;  %2555 = vmatprep.subr.mxu1 %v3079_v0 }
  0x65   :  { %2510 = vmatprep.subr.mxu0 %v154_v14  ;;  %2556 = vmatpush3.msra.mxu1 %v3199_v11 }
  0x66   :  { %2511 = vmatpush3.msra.mxu0 %v154_v14  ;;  %2557 = vmatprep.mubr.msk.f32.mxu1 %vm3080_vm0, %v3079_v0 }
  0x67   :  { %2512 = vmatprep.subr.mxu0 %v153_v15  ;;  %2560 = vmatprep.subr.mxu1 %v3079_v0 }
  0x68   :  { %2513 = vmatpush3.msra.mxu0 %v153_v15 }
  0x69   :  { %2514 = vmatprep.subr.mxu0 %v152_v16 }
  0x6a   :  { %2515 = vmatpush3.msra.mxu0 %v152_v16 }
  0x6b   :  { %2516 = vmatprep.subr.mxu0 %v151_v17 }
  0x6c   :  { %2517 = vmatpush3.msra.mxu0 %v151_v17 }
  0x6d   :  { %2518 = vmatprep.subr.mxu0 %v150_v18 }
  0x6e   :  { %2519 = vmatpush3.msra.mxu0 %v150_v18 }
  0x6f   :  { %2520 = vmatprep.subr.mxu0 %v149_v19 }
  0x70   :  { %2521 = vmatpush3.msra.mxu0 %v149_v19 }
  0x71   :  { %2522 = vmatprep.subr.mxu0 %v148_v20 }
  0x72   :  { %2523 = vmatpush3.msra.mxu0 %v148_v20 }
  0x73   :  { %2524 = vmatprep.subr.mxu0 %v147_v21 }
  0x74   :  { %2525 = vmatpush3.msra.mxu0 %v147_v21 }
  0x75   :  { %2527 = vmatmul.mubr.f32.vlgmr.msra.gmra.mxu0 %v140_v22  ;;  %2593 = vmatprep.subr.mxu0 %v3079_v0 }
  0x76   :  { %2594 = vmatpush3.msra.mxu0 %v3189_v5  ;;  %2529 = vmatprep.mubr.f32.mxu0 %v141_v63 }
  0x77   :  { %2595 = vmatprep.subr.mxu0 %v3079_v0 }
  0x78   :  { %2596 = vmatpush3.msra.mxu0 %v3192_v6 }
  0x79   :  { %2597 = vmatprep.subr.mxu0 %v3079_v0  ;;  %2530 = vmatmul.mubr.f32.gmra.mxu0 %v142_v1 }
  0x7a   :  { %2598 = vmatpush3.msra.mxu0 %v3196_v9 }
  0x7b   :  { %2599 = vmatprep.subr.mxu0 %v3079_v0 }
  0x7c   :  { %2600 = vmatpush3.msra.mxu0 %v3199_v11 }
  0x7d   :  { %2615 = vmatprep.subr.mxu0 %v3079_v0 }
 0x11d   :  { %v358_v23 = vpop.f32.mrf.mxu1 }
 0x11f   :  { %v2548_v24 = vpop.f32.mrf.mxu1 }
 0x135   :  { %v2528_v25 = vpop.f32.mrf.mxu0 }
 0x136   :  { %v242_v48 = vadd.f32 %v2528_v25, %v3228_v26 }
 0x137   :  { %v236_v27 = vpop.f32.mrf.mxu0 }
 0x138   :  { %v237_v28 = vadd.f32 %v3228_v26, %v236_v27 }
 0x139   :  { %v2531_v8 = vpop.f32.mrf.mxu0 }
 0x13a   :  { %v362_v29 = vadd.f32 %v358_v23, %v237_v28 }
 0x13b   :  { %v246_v10 = vpop.f32.mrf.mxu0 }
 0x13c   :  { %v2325_v30 = vmul.f32 -1.442695, %v362_v29  ;;  %v247_v12 = vadd.f32 %v3228_v26, %v246_v10 }
 0x13e   :  { %2770 = vpow2.f32 %v2325_v30 }
 0x13f   :  { %2772 = vtanh.f32 %v362_v29 }
 0x14b   :  { %v2771_v31 = vpop.eup %2770 }
 0x14c   :  { %v367_v32 = vadd.f32 1.0, %v2771_v31  ;;  %v2773_v36 = vpop.eup %2772 }
 0x14e   :  { %2774 = vrcp.f32 %v367_v32  ;;  %v252_v32 = vadd.f32 %v2531_v8, %v3228_v26 }
 0x15b   :  { %v2775_v37 = vpop.eup %2774 }
 0x15c   :  { %v370_v38 = vsel %vm3231_vm3, %v2773_v36, %v2775_v37 }
 0x15d   :  { %373 = vrot.lane.b32.xlu0 %v370_v38, %s3081_s3  ;;  %v371_v41 = vmul.f32 0.0, %v370_v38 }
 0x1cf   :  { %v374_v39 = vpop.permute.xlu0 %373 }
 0x1d0   :  { %v376_v40 = vmul.f32 %v374_v39, %v370_v38 }
 0x1d2   :  { %378 = vrot.lane.b32.xlu0 %v376_v40, %s3082_s22 }
 0x244   :  { %v379_v42 = vpop.permute.xlu0 %378 }
 0x245   :  { %v381_v43 = vadd.f32 %v379_v42, %v371_v41 }
 0x247   :  { %2776 = vtanh.f32 %v381_v43 }
 0x254   :  { %v2777_v44 = vpop.eup %2776 }
 0x255   :  { %384 = vrot.lane.b32.xlu1 %v2777_v44, %s3081_s3 }
 0x2c7   :  { %v385_v45 = vpop.permute.xlu1 %384 }
 0x2c8   :  { %v387_v46 = vmul.f32 %v385_v45, %v370_v38 }
 0x2ca   :  { %389 = vrot.lane.b32.xlu1 %v387_v46, %s3082_s22 }
 0x33c   :  { %v390_v47 = vpop.permute.xlu1 %389 }
 0x33d   :  { %392 = vst.msk [vmem:[#allocation3] sm:$0xff] %vm288_vm4, %v390_v47  ;;  %2558 = vmatmul.mubr.msk.f32.vlgmr.msra.gmra.mxu1 %vm288_vm4, %v390_v47 }
 0x33e   :  { %2561 = vmatpush3.msra.mxu1 %v3189_v5  ;;  %2568 = vmatprep.mubr.msk.f32.mxu1 %vm3080_vm0, %v3079_v0 }
 0x33f   :  { %2562 = vmatprep.subr.mxu1 %v3079_v0 }
 0x340   :  { %2563 = vmatpush3.msra.mxu1 %v3192_v6 }
 0x341   :  { %2564 = vmatprep.subr.mxu1 %v3079_v0 }
 0x342   :  { %2565 = vmatpush3.msra.mxu1 %v3196_v9 }
 0x343   :  { %2566 = vmatprep.subr.mxu1 %v3079_v0 }
 0x344   :  { %2567 = vmatpush3.msra.mxu1 %v3199_v11 }
 0x345   :  { %2571 = vmatprep.subr.mxu1 %v3079_v0 }
 0x3fd   :  { %v467_v49 = vpop.f32.mrf.mxu1 }
 0x3fe   :  { %v471_v50 = vadd.f32 %v467_v49, %v242_v48  ;;  %v143_v48 = vld [vmem:[#allocation4 + $0x20] sm:$0xff]  ;;  %v144_v49 = vld [vmem:[#allocation4 + $0x28] sm:$0xff] }
 0x3ff   :  { %v2559_v51 = vpop.f32.mrf.mxu1  ;;  %2532 = vmatprep.mubr.f32.mxu0 %v143_v48 }
 0x400   :  { %v2327_v52 = vmul.f32 -1.442695, %v471_v50  ;;  %2533 = vmatmul.mubr.f32.gmra.mxu0 %v144_v49 }
 0x402   :  { %2778 = vpow2.f32 %v2327_v52 }
 0x403   :  { %2780 = vtanh.f32 %v471_v50 }
 0x40f   :  { %v2779_v53 = vpop.eup %2778 }
 0x410   :  { %v476_v54 = vadd.f32 1.0, %v2779_v53  ;;  %v2781_v55 = vpop.eup %2780 }
 0x412   :  { %2782 = vrcp.f32 %v476_v54 }
 0x41f   :  { %v2783_v56 = vpop.eup %2782 }
 0x420   :  { %v479_v57 = vsel %vm3231_vm3, %v2781_v55, %v2783_v56 }
 0x421   :  { %482 = vrot.lane.b32.xlu0 %v479_v57, %s3081_s3  ;;  %v480_v60 = vmul.f32 %v479_v57, %v381_v43 }
 0x493   :  { %v483_v58 = vpop.permute.xlu0 %482 }
 0x494   :  { %v485_v59 = vmul.f32 %v483_v58, %v479_v57 }
 0x496   :  { %487 = vrot.lane.b32.xlu1 %v485_v59, %s3082_s22 }
 0x4c0   :  { %v2534_v54 = vpop.f32.mrf.mxu0 }
 0x4c2   :  { %v256_v55 = vpop.f32.mrf.mxu0 }
 0x4c3   :  { %v257_v56 = vadd.f32 %v3228_v26, %v256_v55 }
 0x508   :  { %v488_v61 = vpop.permute.xlu1 %487 }
 0x509   :  { %v490_v62 = vadd.f32 %v488_v61, %v480_v60 }
 0x50b   :  { %2784 = vtanh.f32 %v490_v62 }
 0x518   :  { %v2785_v2 = vpop.eup %2784 }
 0x519   :  { %493 = vrot.lane.b32.xlu0 %v2785_v2, %s3081_s3 }
 0x58b   :  { %v494_v3 = vpop.permute.xlu0 %493 }
 0x58c   :  { %v496_v4 = vmul.f32 %v494_v3, %v479_v57 }
 0x58e   :  { %498 = vrot.lane.b32.xlu1 %v496_v4, %s3082_s22 }
 0x600   :  { %v499_v7 = vpop.permute.xlu1 %498 }
 0x601   :  { %502 = vst.msk [vmem:[#allocation3 + $0x8] sm:$0xff] %vm288_vm4, %v499_v7  ;;  %2569 = vmatmul.mubr.msk.f32.vlgmr.msra.gmra.mxu1 %vm288_vm4, %v499_v7 }
 0x602   :  { %2572 = vmatpush3.msra.mxu1 %v3189_v5  ;;  %2579 = vmatprep.mubr.msk.f32.mxu1 %vm3080_vm0, %v3079_v0 }
 0x603   :  { %2573 = vmatprep.subr.mxu1 %v3079_v0 }
 0x604   :  { %2574 = vmatpush3.msra.mxu1 %v3192_v6 }
 0x605   :  { %2575 = vmatprep.subr.mxu1 %v3079_v0 }
 0x606   :  { %2576 = vmatpush3.msra.mxu1 %v3196_v9 }
 0x607   :  { %2577 = vmatprep.subr.mxu1 %v3079_v0 }
 0x608   :  { %2578 = vmatpush3.msra.mxu1 %v3199_v11 }
 0x609   :  { %2582 = vmatprep.subr.mxu1 %v3079_v0 }
 0x6c1   :  { %v577_v13 = vpop.f32.mrf.mxu1 }
 0x6c2   :  { %v581_v14 = vadd.f32 %v577_v13, %v247_v12  ;;  %v145_v12 = vld [vmem:[#allocation4 + $0x30] sm:$0xff]  ;;  %v146_v13 = vld [vmem:[#allocation4 + $0x38] sm:$0xff] }
 0x6c3   :  { %v2570_v15 = vpop.f32.mrf.mxu1  ;;  %2535 = vmatprep.mubr.f32.mxu0 %v145_v12 }
 0x6c4   :  { %v2329_v16 = vmul.f32 -1.442695, %v581_v14  ;;  %2536 = vmatmul.mubr.f32.gmra.mxu0 %v146_v13 }
 0x6c5   :  { %2601 = vmatprep.mubr.msk.f32.mxu0 %vm3080_vm0, %v3079_v0 }
 0x6c6   :  { %2786 = vpow2.f32 %v2329_v16 }
 0x6c7   :  { %2788 = vtanh.f32 %v581_v14 }
 0x6d3   :  { %v2787_v17 = vpop.eup %2786 }
 0x6d4   :  { %v586_v18 = vadd.f32 1.0, %v2787_v17  ;;  %v2789_v19 = vpop.eup %2788 }
 0x6d6   :  { %2790 = vrcp.f32 %v586_v18 }
 0x6e3   :  { %v2791_v20 = vpop.eup %2790 }
 0x6e4   :  { %v589_v21 = vsel %vm3231_vm3, %v2789_v19, %v2791_v20  ;;  %v262_v19 = vadd.f32 %v2534_v54, %v3228_v26 }
 0x6e5   :  { %592 = vrot.lane.b32.xlu0 %v589_v21, %s3081_s3  ;;  %v590_v24 = vmul.f32 %v589_v21, %v490_v62 }
 0x757   :  { %v593_v22 = vpop.permute.xlu0 %592 }
 0x758   :  { %v595_v23 = vmul.f32 %v593_v22, %v589_v21 }
 0x75a   :  { %597 = vrot.lane.b32.xlu1 %v595_v23, %s3082_s22 }
 0x784   :  { %v3330_v18 = vpop.f32.mrf.mxu0 }
 0x785   :  { %v272_v12 = vadd.f32 %v3330_v18, %v3228_v26 }
 0x7cc   :  { %v598_v25 = vpop.permute.xlu1 %597 }
 0x7cd   :  { %v600_v27 = vadd.f32 %v598_v25, %v590_v24 }
 0x7cf   :  { %2792 = vtanh.f32 %v600_v27 }
 0x7dc   :  { %v2793_v28 = vpop.eup %2792 }
 0x7dd   :  { %603 = vrot.lane.b32.xlu0 %v2793_v28, %s3081_s3 }
 0x84f   :  { %v604_v29 = vpop.permute.xlu0 %603 }
 0x850   :  { %v606_v30 = vmul.f32 %v604_v29, %v589_v21 }
 0x852   :  { %608 = vrot.lane.b32.xlu1 %v606_v30, %s3082_s22 }
 0x8c4   :  { %v609_v31 = vpop.permute.xlu1 %608 }
 0x8c5   :  { %612 = vst.msk [vmem:[#allocation3 + $0x10] sm:$0xff] %vm288_vm4, %v609_v31  ;;  %2580 = vmatmul.mubr.msk.f32.vlgmr.msra.gmra.mxu1 %vm288_vm4, %v609_v31 }
 0x8c6   :  { %2583 = vmatpush3.msra.mxu1 %v3189_v5  ;;  %2590 = vmatprep.mubr.msk.f32.mxu1 %vm3080_vm0, %v3079_v0 }
 0x8c7   :  { %2584 = vmatprep.subr.mxu1 %v3079_v0 }
 0x8c8   :  { %2585 = vmatpush3.msra.mxu1 %v3192_v6 }
 0x8c9   :  { %2586 = vmatprep.subr.mxu1 %v3079_v0 }
 0x8ca   :  { %2587 = vmatpush3.msra.mxu1 %v3196_v9 }
 0x8cb   :  { %2588 = vmatprep.subr.mxu1 %v3079_v0 }
 0x8cc   :  { %2589 = vmatpush3.msra.mxu1 %v3199_v11 }
 0x8cd   :  { %2604 = vmatprep.subr.mxu1 %v3079_v0 }
 0x985   :  { %v687_v33 = vpop.f32.mrf.mxu1 }
 0x986   :  { %v691_v34 = vadd.f32 %v687_v33, %v252_v32  ;;  %v1174_v32 = vld [vmem:[#allocation10 + $0x18] sm:$0xff] }
 0x987   :  { %v2581_v36 = vpop.f32.mrf.mxu1 }
 0x988   :  { %v2331_v37 = vmul.f32 -1.442695, %v691_v34 }
 0x98a   :  { %2794 = vpow2.f32 %v2331_v37 }
 0x98b   :  { %2796 = vtanh.f32 %v691_v34 }
 0x997   :  { %v2795_v38 = vpop.eup %2794 }
 0x998   :  { %v696_v39 = vadd.f32 1.0, %v2795_v38  ;;  %v2797_v40 = vpop.eup %2796  ;;  %v1173_v38 = vld [vmem:[#allocation10 + $0x10] sm:$0xff] }
 0x99a   :  { %2798 = vrcp.f32 %v696_v39  ;;  %v1163_v39 = vld [vmem:[#allocation3] sm:$0xff] }
 0x9a7   :  { %v2799_v41 = vpop.eup %2798 }
 0x9a8   :  { %v699_v42 = vsel %vm3231_vm3, %v2797_v40, %v2799_v41  ;;  %v1172_v40 = vld [vmem:[#allocation10 + $0x8] sm:$0xff]  ;;  %v1171_v41 = vld [vmem:[#allocation10] sm:$0xff] }
 0x9a9   :  { %702 = vrot.lane.b32.xlu0 %v699_v42, %s3081_s3  ;;  %v700_v45 = vmul.f32 %v699_v42, %v600_v27 }
 0xa1b   :  { %v703_v43 = vpop.permute.xlu0 %702 }
 0xa1c   :  { %v705_v44 = vmul.f32 %v703_v43, %v699_v42  ;;  %v1165_v43 = vld [vmem:[#allocation3 + $0x10] sm:$0xff] }
 0xa1e   :  { %707 = vrot.lane.b32.xlu1 %v705_v44, %s3082_s22 }
 0xa90   :  { %v708_v46 = vpop.permute.xlu1 %707 }
 0xa91   :  { %v710_v47 = vadd.f32 %v708_v46, %v700_v45 }
 0xa93   :  { %2800 = vtanh.f32 %v710_v47 }
 0xaa0   :  { %v2801_v50 = vpop.eup %2800 }
 0xaa1   :  { %713 = vrot.lane.b32.xlu0 %v2801_v50, %s3081_s3 }
 0xb13   :  { %v714_v51 = vpop.permute.xlu0 %713 }
 0xb14   :  { %v716_v52 = vmul.f32 %v714_v51, %v699_v42  ;;  %v1164_v42 = vld [vmem:[#allocation3 + $0x8] sm:$0xff] }
 0xb16   :  { %718 = vrot.lane.b32.xlu1 %v716_v52, %s3082_s22 }
 0xb88   :  { %v719_v53 = vpop.permute.xlu1 %718 }
 0xb89   :  { %722 = vst.msk [vmem:[#allocation3 + $0x18] sm:$0xff] %vm288_vm4, %v719_v53  ;;  %2591 = vmatmul.mubr.msk.f32.vlgmr.msra.gmra.mxu1 %vm288_vm4, %v719_v53 }
 0xb8a   :  { %2605 = vmatpush3.msra.mxu1 %v3189_v5  ;;  %2612 = vmatprep.mubr.msk.f32.mxu1 %vm3080_vm0, %v3079_v0 }
 0xb8b   :  { %2606 = vmatprep.subr.mxu1 %v3079_v0 }
 0xb8c   :  { %2607 = vmatpush3.msra.mxu1 %v3192_v6 }
 0xb8d   :  { %2608 = vmatprep.subr.mxu1 %v3079_v0 }
 0xb8e   :  { %2609 = vmatpush3.msra.mxu1 %v3196_v9 }
 0xb8f   :  { %2610 = vmatprep.subr.mxu1 %v3079_v0 }
 0xb90   :  { %2611 = vmatpush3.msra.mxu1 %v3199_v11  ;;  %v1166_v44 = vld [vmem:[#allocation3 + $0x18] sm:$0xff] }
 0xb91   :  { %2626 = vmatprep.subr.mxu1 %v1174_v32 }
 0xc49   :  { %v797_v57 = vpop.f32.mrf.mxu1 }
 0xc4a   :  { %v801_v58 = vadd.f32 %v797_v57, %v257_v56 }
 0xc4b   :  { %v2592_v59 = vpop.f32.mrf.mxu1 }
 0xc4c   :  { %v2333_v60 = vmul.f32 -1.442695, %v801_v58 }
 0xc4e   :  { %2802 = vpow2.f32 %v2333_v60 }
 0xc4f   :  { %2804 = vtanh.f32 %v801_v58 }
 0xc5b   :  { %v2803_v61 = vpop.eup %2802 }
 0xc5c   :  { %v806_v62 = vadd.f32 1.0, %v2803_v61  ;;  %v2805_v63 = vpop.eup %2804 }
 0xc5e   :  { %2806 = vrcp.f32 %v806_v62 }
 0xc6b   :  { %v2807_v1 = vpop.eup %2806 }
 0xc6c   :  { %v809_v2 = vsel %vm3231_vm3, %v2805_v63, %v2807_v1  ;;  %v3357_v63 = vld [vmem:[#allocation12 + $0x18] sm:$0xff]  ;;  %v3360_v1 = vld [vmem:[#allocation12 + $0x10] sm:$0xff] }
 0xc6d   :  { %812 = vrot.lane.b32.xlu0 %v809_v2, %s3081_s3  ;;  %v810_v7 = vmul.f32 %v809_v2, %v710_v47 }
 0xcdf   :  { %v813_v3 = vpop.permute.xlu0 %812 }
 0xce0   :  { %v815_v4 = vmul.f32 %v813_v3, %v809_v2  ;;  %v3368_v3 = vld [vmem:[#allocation12] sm:$0xff] }
 0xce2   :  { %817 = vrot.lane.b32.xlu1 %v815_v4, %s3082_s22 }
 0xd54   :  { %v818_v8 = vpop.permute.xlu1 %817 }
 0xd55   :  { %v820_v10 = vadd.f32 %v818_v8, %v810_v7 }
 0xd57   :  { %2808 = vtanh.f32 %v820_v10 }
 0xd64   :  { %v2809_v14 = vpop.eup %2808 }
 0xd65   :  { %823 = vrot.lane.b32.xlu0 %v2809_v14, %s3081_s3 }
 0xdd7   :  { %v824_v15 = vpop.permute.xlu0 %823 }
 0xdd8   :  { %v826_v16 = vmul.f32 %v824_v15, %v809_v2  ;;  %v3364_v2 = vld [vmem:[#allocation12 + $0x8] sm:$0xff] }
 0xdda   :  { %828 = vrot.lane.b32.xlu1 %v826_v16, %s3082_s22 }
 0xe4c   :  { %v829_v17 = vpop.permute.xlu1 %828 }
 0xe4d   :  { %832 = vst.msk [vmem:[#allocation3 + $0x20] sm:$0xff] %vm288_vm4, %v829_v17  ;;  %2602 = vmatmul.mubr.msk.f32.vlgmr.msra.gmra.mxu0 %vm288_vm4, %v829_v17 }
 0xe4e   :  { %2616 = vmatpush3.msra.mxu0 %v3189_v5  ;;  %2623 = vmatprep.mubr.msk.f32.mxu0 %vm3080_vm0, %v3079_v0  ;;  %v266_v5 = vpop.f32.mrf.mxu0 }
 0xe4f   :  { %2617 = vmatprep.subr.mxu0 %v3079_v0  ;;  %v267_v47 = vadd.f32 %v3228_v26, %v266_v5  ;;  %v3405_v5 = vld [vmem:[%s3571_s6] ss:$0 sm:$0xff] }
 0xe50   :  { %2618 = vmatpush3.msra.mxu0 %v3192_v6 }
 0xe51   :  { %2619 = vmatprep.subr.mxu0 %v3079_v0 }
 0xe52   :  { %2620 = vmatpush3.msra.mxu0 %v3196_v9 }
 0xe53   :  { %2621 = vmatprep.subr.mxu0 %v3079_v0 }
 0xe54   :  { %2622 = vmatpush3.msra.mxu0 %v3199_v11  ;;  %v1167_v45 = vld [vmem:[#allocation3 + $0x20] sm:$0xff] }
 0xe55   :  { %2646 = vmatprep.subr.mxu0 %v3079_v0 }
 0xf0d   :  { %v907_v20 = vpop.f32.mrf.mxu0 }
 0xf0e   :  { %v911_v21 = vadd.f32 %v907_v20, %v262_v19 }
 0xf0f   :  { %v2603_v22 = vpop.f32.mrf.mxu0 }
 0xf10   :  { %v2335_v23 = vmul.f32 -1.442695, %v911_v21 }
 0xf12   :  { %2810 = vpow2.f32 %v2335_v23 }
 0xf13   :  { %2812 = vtanh.f32 %v911_v21 }
 0xf1f   :  { %v2811_v6 = vpop.eup %2810 }
 0xf20   :  { %v916_v24 = vadd.f32 1.0, %v2811_v6  ;;  %v2813_v9 = vpop.eup %2812 }
 0xf22   :  { %2814 = vrcp.f32 %v916_v24 }
 0xf2f   :  { %v2815_v25 = vpop.eup %2814 }
 0xf30   :  { %v919_v11 = vsel %vm3231_vm3, %v2813_v9, %v2815_v25 }
 0xf31   :  { %922 = vrot.lane.b32.xlu0 %v919_v11, %s3081_s3  ;;  %v920_v29 = vmul.f32 %v919_v11, %v820_v10 }
 0xfa3   :  { %v923_v27 = vpop.permute.xlu0 %922 }
 0xfa4   :  { %v925_v28 = vmul.f32 %v923_v27, %v919_v11 }
 0xfa6   :  { %927 = vrot.lane.b32.xlu1 %v925_v28, %s3082_s22 }
0x1018   :  { %v928_v30 = vpop.permute.xlu1 %927 }
0x1019   :  { %v930_v31 = vadd.f32 %v928_v30, %v920_v29 }
0x101b   :  { %2816 = vtanh.f32 %v930_v31 }
0x1028   :  { %v2817_v33 = vpop.eup %2816 }
0x1029   :  { %933 = vrot.lane.b32.xlu0 %v2817_v33, %s3081_s3 }
0x109b   :  { %v934_v34 = vpop.permute.xlu0 %933 }
0x109c   :  { %v936_v36 = vmul.f32 %v934_v34, %v919_v11 }
0x109e   :  { %938 = vrot.lane.b32.xlu1 %v936_v36, %s3082_s22 }
0x1110   :  { %v939_v37 = vpop.permute.xlu1 %938 }
0x1111   :  { %942 = vst.msk [vmem:[#allocation3 + $0x28] sm:$0xff] %vm288_vm4, %v939_v37  ;;  %2613 = vmatmul.mubr.msk.f32.vlgmr.msra.gmra.mxu1 %vm288_vm4, %v939_v37 }
0x1112   :  { %2627 = vmatpush3.msra.mxu1 %v1174_v32  ;;  %2634 = vmatprep.mubr.msk.f32.mxu1 %vm288_vm4, %v1163_v39 }
0x1113   :  { %2628 = vmatprep.subr.mxu1 %v1173_v38 }
0x1114   :  { %2629 = vmatpush3.msra.mxu1 %v1173_v38 }
0x1115   :  { %2630 = vmatprep.subr.mxu1 %v1172_v40 }
0x1116   :  { %2631 = vmatpush3.msra.mxu1 %v1172_v40 }
0x1117   :  { %2632 = vmatprep.subr.mxu1 %v1171_v41 }
0x1118   :  { %2633 = vmatpush3.msra.mxu1 %v1171_v41  ;;  %v1168_v46 = vld [vmem:[#allocation3 + $0x28] sm:$0xff] }
0x1119   :  { %2635 = vmatmul.mubr.msk.f32.vlgmr.msra.gmra.mxu1 %vm288_vm4, %v1164_v42  ;;  %2668 = vmatprep.subr.mxu1 %v3079_v0 }
0x111a   :  { %2637 = vmatprep.mubr.msk.f32.mxu1 %vm288_vm4, %v1165_v43  ;;  %2669 = vmatpush3.msra.mxu1 %v3357_v63 }
0x111b   :  { %2670 = vmatprep.subr.mxu1 %v3079_v0 }
0x111c   :  { %2671 = vmatpush3.msra.mxu1 %v3360_v1 }
0x111d   :  { %2638 = vmatmul.mubr.msk.f32.gmra.mxu1 %vm288_vm4, %v1166_v44  ;;  %2672 = vmatprep.subr.mxu1 %v3079_v0 }
0x111e   :  { %2640 = vmatprep.mubr.msk.f32.mxu1 %vm288_vm4, %v1167_v45  ;;  %2673 = vmatpush3.msra.mxu1 %v3364_v2 }
0x111f   :  { %2674 = vmatprep.subr.mxu1 %v3079_v0 }
0x1120   :  { %2675 = vmatpush3.msra.mxu1 %v3368_v3 }
0x1121   :  { %2641 = vmatmul.mubr.msk.f32.gmra.mxu1 %vm288_vm4, %v1168_v46  ;;  %2690 = vmatprep.subr.mxu1 %v3079_v0 }
0x11d1   :  { %v1017_v48 = vpop.f32.mrf.mxu1 }
0x11d2   :  { %v1021_v49 = vadd.f32 %v1017_v48, %v267_v47 }
0x11d3   :  { %v2614_v50 = vpop.f32.mrf.mxu1 }
0x11d4   :  { %v2337_v51 = vmul.f32 -1.442695, %v1021_v49 }
0x11d6   :  { %2818 = vpow2.f32 %v2337_v51 }
0x11d7   :  { %2820 = vtanh.f32 %v1021_v49 }
0x11d9   :  { %v3400_v13 = vpop.f32.mrf.mxu1 }
0x11da   :  { %v1278_v49 = vadd.f32 %v3400_v13, %v3405_v5 }
0x11db   :  { %v1272_v17 = vpop.f32.mrf.mxu1 }
0x11dc   :  { %v1273_v19 = vadd.f32 %v3405_v5, %v1272_v17 }
0x11e3   :  { %v2819_v52 = vpop.eup %2818 }
0x11e4   :  { %v1026_v53 = vadd.f32 1.0, %v2819_v52  ;;  %v2821_v54 = vpop.eup %2820 }
0x11e6   :  { %2822 = vrcp.f32 %v1026_v53 }
0x11f3   :  { %v2823_v55 = vpop.eup %2822 }
0x11f4   :  { %v1029_v56 = vsel %vm3231_vm3, %v2821_v54, %v2823_v55 }
0x11f5   :  { %1032 = vrot.lane.b32.xlu0 %v1029_v56, %s3081_s3  ;;  %v1030_v59 = vmul.f32 %v1029_v56, %v930_v31 }
0x1267   :  { %v1033_v57 = vpop.permute.xlu0 %1032 }
0x1268   :  { %v1035_v58 = vmul.f32 %v1033_v57, %v1029_v56 }
0x126a   :  { %1037 = vrot.lane.b32.xlu1 %v1035_v58, %s3082_s22 }
0x12dc   :  { %v1038_v60 = vpop.permute.xlu1 %1037 }
0x12dd   :  { %v3353_v61 = vadd.f32 %v1038_v60, %v1030_v59 }
0x12df   :  { %2824 = vtanh.f32 %v3353_v61 }
0x12ec   :  { %v2825_v62 = vpop.eup %2824 }
0x12ed   :  { %1043 = vrot.lane.b32.xlu0 %v2825_v62, %s3081_s3 }
0x135f   :  { %v1044_v4 = vpop.permute.xlu0 %1043 }
0x1360   :  { %v1046_v7 = vmul.f32 %v1044_v4, %v1029_v56 }
0x1362   :  { %1048 = vrot.lane.b32.xlu1 %v1046_v7, %s3082_s22 }
0x13d4   :  { %v1049_v8 = vpop.permute.xlu1 %1048 }
0x13d5   :  { %1052 = vst.msk [vmem:[#allocation3 + $0x30] sm:$0xff] %vm288_vm4, %v1049_v8  ;;  %2624 = vmatmul.mubr.msk.f32.vlgmr.msra.gmra.mxu0 %vm288_vm4, %v1049_v8 }
0x13d6   :  { %2647 = vmatpush3.msra.mxu0 %v3357_v63  ;;  %2654 = vmatprep.mubr.msk.f32.mxu0 %vm3080_vm0, %v3079_v0 }
0x13d7   :  { %2648 = vmatprep.subr.mxu0 %v3079_v0 }
0x13d8   :  { %2649 = vmatpush3.msra.mxu0 %v3360_v1 }
0x13d9   :  { %2650 = vmatprep.subr.mxu0 %v3079_v0 }
0x13da   :  { %2651 = vmatpush3.msra.mxu0 %v3364_v2 }
0x13db   :  { %2652 = vmatprep.subr.mxu0 %v3079_v0 }
0x13dc   :  { %2653 = vmatpush3.msra.mxu0 %v3368_v3  ;;  %v1169_v10 = vld [vmem:[#allocation3 + $0x30] sm:$0xff] }
0x13dd   :  { %2655 = vmatmul.mubr.f32.vlgmr.msra.gmra.mxu0 %v3079_v0  ;;  %2643 = vmatprep.mubr.msk.f32.mxu1 %vm288_vm4, %v1169_v10 }
0x13de   :  { %2657 = vmatprep.subr.mxu0 %v3079_v0  ;;  %2665 = vmatprep.mubr.msk.f32.mxu0 %vm3080_vm0, %v3079_v0 }
0x13df   :  { %2658 = vmatpush3.msra.mxu0 %v3357_v63 }
0x13e0   :  { %2659 = vmatprep.subr.mxu0 %v3079_v0 }
0x13e1   :  { %2660 = vmatpush3.msra.mxu0 %v3360_v1 }
0x13e2   :  { %2661 = vmatprep.subr.mxu0 %v3079_v0 }
0x13e3   :  { %2662 = vmatpush3.msra.mxu0 %v3364_v2 }
0x13e4   :  { %2663 = vmatprep.subr.mxu0 %v3079_v0 }
0x13e5   :  { %2664 = vmatpush3.msra.mxu0 %v3368_v3 }
0x13e6   :  { %2679 = vmatprep.subr.mxu0 %v3079_v0 }
0x1495   :  { %v1127_v14 = vpop.f32.mrf.mxu0 }
0x1496   :  { %v1131_v15 = vadd.f32 %v1127_v14, %v272_v12 }
0x1497   :  { %v2625_v16 = vpop.f32.mrf.mxu0 }
0x1498   :  { %v2339_v27 = vmul.f32 -1.442695, %v1131_v15 }
0x149d   :  { %v1390_v20 = vpop.f32.mrf.mxu0 }
0x149e   :  { %v1394_v21 = vadd.f32 %v1390_v20, %v1273_v19 }
0x149f   :  { %v2656_v22 = vpop.f32.mrf.mxu0 }
0x14a0   :  { %v2349_v23 = vmul.f32 -1.442695, %v1394_v21 }
0x14a2   :  { %2826 = vpow2.f32 %v2349_v23 }
0x14a3   :  { %2828 = vtanh.f32 %v1394_v21 }
0x14af   :  { %v2827_v6 = vpop.eup %2826 }
0x14b0   :  { %v1399_v26 = vadd.f32 1.0, %v2827_v6  ;;  %v2829_v18 = vpop.eup %2828 }
0x14b2   :  { %2830 = vrcp.f32 %v1399_v26 }
0x14b3   :  { %2832 = vpow2.f32 %v2339_v27 }
0x14bf   :  { %v2831_v24 = vpop.eup %2830 }
0x14c0   :  { %v1402_v9 = vsel %vm3231_vm3, %v2829_v18, %v2831_v24  ;;  %v2833_v28 = vpop.eup %2832 }
0x14c1   :  { %1405 = vrot.lane.b32.xlu0 %v1402_v9, %s3081_s3  ;;  %v1403_v29 = vmul.f32 0.0, %v1402_v9  ;;  %v1136_v30 = vadd.f32 1.0, %v2833_v28 }
0x1533   :  { %v1406_v25 = vpop.permute.xlu0 %1405 }
0x1534   :  { %v1408_v11 = vmul.f32 %v1406_v25, %v1402_v9 }
0x1536   :  { %1410 = vrot.lane.b32.xlu1 %v1408_v11, %s3082_s22 }
0x15a8   :  { %v1411_v31 = vpop.permute.xlu1 %1410 }
0x15a9   :  { %v1413_v32 = vadd.f32 %v1411_v31, %v1403_v29 }
0x15ab   :  { %2834 = vtanh.f32 %v1413_v32 }
0x15ac   :  { %2836 = vrcp.f32 %v1136_v30 }
0x15ad   :  { %2838 = vtanh.f32 %v1131_v15  ;;  %v2639_v15 = vpop.f32.mrf.mxu1 }
0x15af   :  { %v1282_v16 = vpop.f32.mrf.mxu1 }
0x15b0   :  { %v1283_v22 = vadd.f32 %v3405_v5, %v1282_v16 }
0x15b1   :  { %v3455_v17 = vpop.f32.mrf.mxu1 }
0x15b3   :  { %v3457_v19 = vpop.f32.mrf.mxu1 }
0x15b8   :  { %v2835_v33 = vpop.eup %2834 }
0x15b9   :  { %v2837_v34 = vpop.eup %2836  ;;  %1416 = vrot.lane.b32.xlu0 %v2835_v33, %s3081_s3 }
0x15ba   :  { %v2839_v36 = vpop.eup %2838 }
0x15bb   :  { %v1139_v37 = vsel %vm3231_vm3, %v2839_v36, %v2837_v34 }
0x15bc   :  { %v1140_v43 = vmul.f32 %v1139_v37, %v3353_v61 }
0x15bd   :  { %1142 = vrot.lane.b32.xlu0 %v1139_v37, %s3081_s3 }
0x162b   :  { %v1417_v38 = vpop.permute.xlu0 %1416 }
0x162c   :  { %v1419_v39 = vmul.f32 %v1417_v38, %v1402_v9  ;;  %v1288_v38 = vadd.f32 %v2639_v15, %v3405_v5 }
0x162e   :  { %1422 = vrot.lane.b32.xlu1 %v1419_v39, %s3082_s22 }
0x162f   :  { %v1143_v40 = vpop.permute.xlu0 %1142 }
0x1630   :  { %v1145_v41 = vmul.f32 %v1143_v40, %v1139_v37 }
0x1632   :  { %1147 = vrot.lane.b32.xlu0 %v1145_v41, %s3082_s22 }
0x16a0   :  { %v1423_v42 = vpop.permute.xlu1 %1422 }
0x16a1   :  { %2666 = vmatmul.mubr.msk.f32.vlgmr.msra.gmra.mxu0 %vm288_vm4, %v1423_v42 }
0x16a2   :  { %2680 = vmatpush3.msra.mxu0 %v3357_v63  ;;  %2687 = vmatprep.mubr.msk.f32.mxu0 %vm3080_vm0, %v3079_v0 }
0x16a3   :  { %2681 = vmatprep.subr.mxu0 %v3079_v0 }
0x16a4   :  { %v1148_v44 = vpop.permute.xlu0 %1147  ;;  %2682 = vmatpush3.msra.mxu0 %v3360_v1 }
0x16a5   :  { %v1150_v45 = vadd.f32 %v1148_v44, %v1140_v43  ;;  %2683 = vmatprep.subr.mxu0 %v3079_v0 }
0x16a6   :  { %2684 = vmatpush3.msra.mxu0 %v3364_v2 }
0x16a7   :  { %2840 = vtanh.f32 %v1150_v45  ;;  %2685 = vmatprep.subr.mxu0 %v3079_v0 }
0x16a8   :  { %2686 = vmatpush3.msra.mxu0 %v3368_v3 }
0x16a9   :  { %2701 = vmatprep.subr.mxu0 %v3079_v0 }
0x16b4   :  { %v2841_v46 = vpop.eup %2840 }
0x16b5   :  { %1153 = vrot.lane.b32.xlu0 %v2841_v46, %s3081_s3 }
0x1727   :  { %v1154_v47 = vpop.permute.xlu0 %1153 }
0x1728   :  { %v1156_v48 = vmul.f32 %v1154_v47, %v1139_v37 }
0x172a   :  { %1158 = vrot.lane.b32.xlu0 %v1156_v48, %s3082_s22 }
0x1761   :  { %v1492_v50 = vpop.f32.mrf.mxu0 }
0x1762   :  { %v1496_v51 = vadd.f32 %v1492_v50, %v1278_v49 }
0x1763   :  { %v2667_v52 = vpop.f32.mrf.mxu0 }
0x1764   :  { %v2351_v53 = vmul.f32 -1.442695, %v1496_v51 }
0x1766   :  { %2842 = vpow2.f32 %v2351_v53 }
0x1767   :  { %2844 = vtanh.f32 %v1496_v51 }
0x1773   :  { %v2843_v54 = vpop.eup %2842 }
0x1774   :  { %v1501_v55 = vadd.f32 1.0, %v2843_v54  ;;  %v2845_v56 = vpop.eup %2844 }
0x1776   :  { %2846 = vrcp.f32 %v1501_v55 }
0x1783   :  { %v2847_v57 = vpop.eup %2846 }
0x1784   :  { %v1504_v58 = vsel %vm3231_vm3, %v2845_v56, %v2847_v57  ;;  %v1293_v57 = vadd.f32 %v3405_v5, %v3457_v19 }
0x1785   :  { %1507 = vrot.lane.b32.xlu1 %v1504_v58, %s3081_s3  ;;  %v1505_v4 = vmul.f32 %v1504_v58, %v1413_v32 }
0x179c   :  { %v1159_v59 = vpop.permute.xlu0 %1158 }
0x179d   :  { %1162 = vst.msk [vmem:[#allocation3 + $0x38] sm:$0xff] %vm288_vm4, %v1159_v59 }
0x17a4   :  { %v1170_v60 = vld [vmem:[#allocation3 + $0x38] sm:$0xff] }
0x17a5   :  { %2644 = vmatmul.mubr.msk.f32.gmra.mxu1 %vm288_vm4, %v1170_v60 }
0x17a6   :  { %2676 = vmatprep.mubr.msk.f32.mxu1 %vm3080_vm0, %v3079_v0 }
0x17f7   :  { %v1508_v61 = vpop.permute.xlu1 %1507 }
0x17f8   :  { %v1510_v62 = vmul.f32 %v1508_v61, %v1504_v58 }
0x17fa   :  { %1512 = vrot.lane.b32.xlu1 %v1510_v62, %s3082_s22 }
0x1865   :  { %v3459_v20 = vpop.f32.mrf.mxu1 }
0x1867   :  { %v3461_v21 = vpop.f32.mrf.mxu1 }
0x186c   :  { %v1513_v7 = vpop.permute.xlu1 %1512 }
0x186d   :  { %v1515_v8 = vadd.f32 %v1513_v7, %v1505_v4 }
0x186f   :  { %2848 = vtanh.f32 %v1515_v8 }
0x187c   :  { %v2849_v10 = vpop.eup %2848 }
0x187d   :  { %1518 = vrot.lane.b32.xlu1 %v2849_v10, %s3081_s3 }
0x18ef   :  { %v1519_v12 = vpop.permute.xlu1 %1518 }
0x18f0   :  { %v1521_v13 = vmul.f32 %v1519_v12, %v1504_v58 }
0x18f2   :  { %1524 = vrot.lane.b32.xlu1 %v1521_v13, %s3082_s22 }
0x1964   :  { %v1525_v14 = vpop.permute.xlu1 %1524 }
0x1965   :  { %2677 = vmatmul.mubr.msk.f32.vlgmr.msra.gmra.mxu1 %vm288_vm4, %v1525_v14 }
0x1966   :  { %2691 = vmatpush3.msra.mxu1 %v3357_v63  ;;  %2698 = vmatprep.mubr.msk.f32.mxu1 %vm3080_vm0, %v3079_v0 }
0x1967   :  { %2692 = vmatprep.subr.mxu1 %v3079_v0 }
0x1968   :  { %2693 = vmatpush3.msra.mxu1 %v3360_v1 }
0x1969   :  { %2694 = vmatprep.subr.mxu1 %v3079_v0 }
0x196a   :  { %2695 = vmatpush3.msra.mxu1 %v3364_v2 }
0x196b   :  { %2696 = vmatprep.subr.mxu1 %v3079_v0 }
0x196c   :  { %2697 = vmatpush3.msra.mxu1 %v3368_v3 }
0x196d   :  { %2712 = vmatprep.subr.mxu1 %v3079_v0 }
0x1a25   :  { %v1594_v23 = vpop.f32.mrf.mxu1 }
0x1a26   :  { %v1598_v6 = vadd.f32 %v1594_v23, %v1283_v22 }
0x1a27   :  { %v2678_v26 = vpop.f32.mrf.mxu1 }
0x1a28   :  { %v2353_v18 = vmul.f32 -1.442695, %v1598_v6 }
0x1a2a   :  { %2850 = vpow2.f32 %v2353_v18 }
0x1a2b   :  { %2852 = vtanh.f32 %v1598_v6 }
0x1a37   :  { %v2851_v24 = vpop.eup %2850 }
0x1a38   :  { %v1603_v9 = vadd.f32 1.0, %v2851_v24  ;;  %v2853_v25 = vpop.eup %2852 }
0x1a3a   :  { %2854 = vrcp.f32 %v1603_v9 }
0x1a47   :  { %v2855_v11 = vpop.eup %2854 }
0x1a48   :  { %v1606_v27 = vsel %vm3231_vm3, %v2853_v25, %v2855_v11 }
0x1a49   :  { %1609 = vrot.lane.b32.xlu0 %v1606_v27, %s3081_s3  ;;  %v1607_v30 = vmul.f32 %v1606_v27, %v1515_v8 }
0x1abb   :  { %v1610_v28 = vpop.permute.xlu0 %1609 }
0x1abc   :  { %v1612_v29 = vmul.f32 %v1610_v28, %v1606_v27 }
0x1abe   :  { %1614 = vrot.lane.b32.xlu1 %v1612_v29, %s3082_s22 }
0x1b30   :  { %v1615_v31 = vpop.permute.xlu1 %1614 }
0x1b31   :  { %v1617_v32 = vadd.f32 %v1615_v31, %v1607_v30 }
0x1b33   :  { %2856 = vtanh.f32 %v1617_v32 }
0x1b40   :  { %v2857_v33 = vpop.eup %2856 }
0x1b41   :  { %1620 = vrot.lane.b32.xlu0 %v2857_v33, %s3081_s3 }
0x1bb3   :  { %v1621_v34 = vpop.permute.xlu0 %1620 }
0x1bb4   :  { %v1623_v36 = vmul.f32 %v1621_v34, %v1606_v27 }
0x1bb6   :  { %1626 = vrot.lane.b32.xlu1 %v1623_v36, %s3082_s22  ;;  %v1303_v36 = vadd.f32 %v3405_v5, %v3461_v21 }
0x1c28   :  { %v1627_v37 = vpop.permute.xlu1 %1626 }
0x1c29   :  { %2688 = vmatmul.mubr.msk.f32.vlgmr.msra.gmra.mxu0 %vm288_vm4, %v1627_v37 }
0x1c2a   :  { %2702 = vmatpush3.msra.mxu0 %v3357_v63  ;;  %2709 = vmatprep.mubr.msk.f32.mxu0 %vm3080_vm0, %v3079_v0 }
0x1c2b   :  { %2703 = vmatprep.subr.mxu0 %v3079_v0 }
0x1c2c   :  { %2704 = vmatpush3.msra.mxu0 %v3360_v1 }
0x1c2d   :  { %2705 = vmatprep.subr.mxu0 %v3079_v0 }
0x1c2e   :  { %2706 = vmatpush3.msra.mxu0 %v3364_v2 }
0x1c2f   :  { %2707 = vmatprep.subr.mxu0 %v3079_v0 }
0x1c30   :  { %2708 = vmatpush3.msra.mxu0 %v3368_v3 }
0x1c31   :  { %2723 = vmatprep.subr.mxu0 %v3079_v0 }
0x1ce9   :  { %v1696_v39 = vpop.f32.mrf.mxu0 }
0x1cea   :  { %v1700_v40 = vadd.f32 %v1696_v39, %v1288_v38 }
0x1ceb   :  { %v2689_v41 = vpop.f32.mrf.mxu0 }
0x1cec   :  { %v2355_v42 = vmul.f32 -1.442695, %v1700_v40 }
0x1cee   :  { %2858 = vpow2.f32 %v2355_v42 }
0x1cef   :  { %2860 = vtanh.f32 %v1700_v40 }
0x1cfb   :  { %v2859_v43 = vpop.eup %2858 }
0x1cfc   :  { %v1705_v44 = vadd.f32 1.0, %v2859_v43  ;;  %v2861_v45 = vpop.eup %2860 }
0x1cfe   :  { %2862 = vrcp.f32 %v1705_v44 }
0x1d0b   :  { %v2863_v46 = vpop.eup %2862 }
0x1d0c   :  { %v1708_v47 = vsel %vm3231_vm3, %v2861_v45, %v2863_v46 }
0x1d0d   :  { %1711 = vrot.lane.b32.xlu0 %v1708_v47, %s3081_s3  ;;  %v1709_v50 = vmul.f32 %v1708_v47, %v1617_v32 }
0x1d7f   :  { %v1712_v48 = vpop.permute.xlu0 %1711 }
0x1d80   :  { %v1714_v49 = vmul.f32 %v1712_v48, %v1708_v47 }
0x1d82   :  { %1716 = vrot.lane.b32.xlu1 %v1714_v49, %s3082_s22 }
0x1df4   :  { %v1717_v51 = vpop.permute.xlu1 %1716 }
0x1df5   :  { %v1719_v52 = vadd.f32 %v1717_v51, %v1709_v50 }
0x1df7   :  { %2864 = vtanh.f32 %v1719_v52 }
0x1e04   :  { %v2865_v53 = vpop.eup %2864 }
0x1e05   :  { %1722 = vrot.lane.b32.xlu0 %v2865_v53, %s3081_s3 }
0x1e77   :  { %v1723_v54 = vpop.permute.xlu0 %1722 }
0x1e78   :  { %v1725_v55 = vmul.f32 %v1723_v54, %v1708_v47  ;;  %v1308_v54 = vadd.f32 %v3459_v20, %v3405_v5 }
0x1e7a   :  { %1728 = vrot.lane.b32.xlu1 %v1725_v55, %s3082_s22 }
0x1eec   :  { %v1729_v56 = vpop.permute.xlu1 %1728 }
0x1eed   :  { %2699 = vmatmul.mubr.msk.f32.vlgmr.msra.gmra.mxu1 %vm288_vm4, %v1729_v56 }
0x1eee   :  { %2713 = vmatpush3.msra.mxu1 %v3357_v63  ;;  %2720 = vmatprep.mubr.msk.f32.mxu1 %vm3080_vm0, %v3079_v0 }
0x1eef   :  { %2714 = vmatprep.subr.mxu1 %v3079_v0 }
0x1ef0   :  { %2715 = vmatpush3.msra.mxu1 %v3360_v1 }
0x1ef1   :  { %2716 = vmatprep.subr.mxu1 %v3079_v0 }
0x1ef2   :  { %2717 = vmatpush3.msra.mxu1 %v3364_v2 }
0x1ef3   :  { %2718 = vmatprep.subr.mxu1 %v3079_v0 }
0x1ef4   :  { %2719 = vmatpush3.msra.mxu1 %v3368_v3 }
0x1ef5   :  { %2734 = vmatprep.subr.mxu1 %v3079_v0 }
0x1fad   :  { %v1798_v58 = vpop.f32.mrf.mxu1 }
0x1fae   :  { %v1802_v59 = vadd.f32 %v1798_v58, %v1293_v57 }
0x1faf   :  { %v2700_v60 = vpop.f32.mrf.mxu1 }
0x1fb0   :  { %v2357_v61 = vmul.f32 -1.442695, %v1802_v59 }
0x1fb2   :  { %2866 = vpow2.f32 %v2357_v61 }
0x1fb3   :  { %2868 = vtanh.f32 %v1802_v59 }
0x1fbf   :  { %v2867_v62 = vpop.eup %2866 }
0x1fc0   :  { %v1807_v4 = vadd.f32 1.0, %v2867_v62  ;;  %v2869_v7 = vpop.eup %2868 }
0x1fc2   :  { %2870 = vrcp.f32 %v1807_v4 }
0x1fcf   :  { %v2871_v8 = vpop.eup %2870 }
0x1fd0   :  { %v1810_v10 = vsel %vm3231_vm3, %v2869_v7, %v2871_v8 }
0x1fd1   :  { %1813 = vrot.lane.b32.xlu0 %v1810_v10, %s3081_s3  ;;  %v1811_v14 = vmul.f32 %v1810_v10, %v1719_v52 }
0x2043   :  { %v1814_v12 = vpop.permute.xlu0 %1813 }
0x2044   :  { %v1816_v13 = vmul.f32 %v1814_v12, %v1810_v10  ;;  %v2137_v12 = vld [vmem:[#allocation13 + $0x18] sm:$0xff] }
0x2046   :  { %1818 = vrot.lane.b32.xlu1 %v1816_v13, %s3082_s22  ;;  %v2136_v13 = vld [vmem:[#allocation13 + $0x10] sm:$0xff] }
0x20b8   :  { %v1819_v15 = vpop.permute.xlu1 %1818 }
0x20b9   :  { %v1821_v16 = vadd.f32 %v1819_v15, %v1811_v14  ;;  %v2135_v14 = vld [vmem:[#allocation13 + $0x8] sm:$0xff] }
0x20bb   :  { %2872 = vtanh.f32 %v1821_v16 }
0x20c8   :  { %v2873_v19 = vpop.eup %2872 }
0x20c9   :  { %1824 = vrot.lane.b32.xlu0 %v2873_v19, %s3081_s3 }
0x213b   :  { %v1825_v22 = vpop.permute.xlu0 %1824 }
0x213c   :  { %v1827_v23 = vmul.f32 %v1825_v22, %v1810_v10 }
0x213e   :  { %1830 = vrot.lane.b32.xlu1 %v1827_v23, %s3082_s22  ;;  %v2224_v23 = vld [vmem:[#allocation15 + $0x18] sm:$0xff] }
0x21b0   :  { %v1831_v6 = vpop.permute.xlu1 %1830 }
0x21b1   :  { %2710 = vmatmul.mubr.msk.f32.vlgmr.msra.gmra.mxu0 %vm288_vm4, %v1831_v6  ;;  %v2223_v6 = vld [vmem:[#allocation15 + $0x10] sm:$0xff] }
0x21b2   :  { %2724 = vmatpush3.msra.mxu0 %v3357_v63  ;;  %2731 = vmatprep.mubr.msk.f32.mxu0 %vm3080_vm0, %v3079_v0  ;;  %v1298_v63 = vadd.f32 %v3455_v17, %v3405_v5 }
0x21b3   :  { %2725 = vmatprep.subr.mxu0 %v3079_v0 }
0x21b4   :  { %2726 = vmatpush3.msra.mxu0 %v3360_v1 }
0x21b5   :  { %2727 = vmatprep.subr.mxu0 %v3079_v0 }
0x21b6   :  { %2728 = vmatpush3.msra.mxu0 %v3364_v2 }
0x21b7   :  { %2729 = vmatprep.subr.mxu0 %v3079_v0 }
0x21b8   :  { %2730 = vmatpush3.msra.mxu0 %v3368_v3 }
0x21b9   :  { %2745 = vmatprep.subr.mxu0 %v3079_v0 }
0x2271   :  { %v1900_v26 = vpop.f32.mrf.mxu0 }
0x2272   :  { %v1904_v18 = vadd.f32 %v1900_v26, %v1298_v63  ;;  %v2222_v63 = vld [vmem:[#allocation15 + $0x8] sm:$0xff]  ;;  %v2221_v26 = vld [vmem:[#allocation15] sm:$0xff] }
0x2273   :  { %v2711_v24 = vpop.f32.mrf.mxu0 }
0x2274   :  { %v2359_v9 = vmul.f32 -1.442695, %v1904_v18 }
0x2276   :  { %2874 = vpow2.f32 %v2359_v9 }
0x2277   :  { %2876 = vtanh.f32 %v1904_v18  ;;  %v2364_v18 = vld [vmem:[%s3573_s8] ss:$0 sm:$0xff] }
0x2283   :  { %v2875_v25 = vpop.eup %2874 }
0x2284   :  { %v1909_v1 = vadd.f32 1.0, %v2875_v25  ;;  %v2877_v11 = vpop.eup %2876 }
0x2286   :  { %2878 = vrcp.f32 %v1909_v1 }
0x2293   :  { %v2879_v2 = vpop.eup %2878 }
0x2294   :  { %v1912_v27 = vsel %vm3231_vm3, %v2877_v11, %v2879_v2  ;;  %v2366_v11 = vld [vmem:[%s3575_s10] ss:$0 sm:$0xff] }
0x2295   :  { %1915 = vrot.lane.b32.xlu0 %v1912_v27, %s3081_s3  ;;  %v1913_v17 = vmul.f32 %v1912_v27, %v1821_v16 }
0x2307   :  { %v1916_v3 = vpop.permute.xlu0 %1915 }
0x2308   :  { %v1918_v28 = vmul.f32 %v1916_v3, %v1912_v27 }
0x230a   :  { %1920 = vrot.lane.b32.xlu1 %v1918_v28, %s3082_s22 }
0x237c   :  { %v1921_v29 = vpop.permute.xlu1 %1920 }
0x237d   :  { %v1923_v30 = vadd.f32 %v1921_v29, %v1913_v17 }
0x237f   :  { %2880 = vtanh.f32 %v1923_v30 }
0x238c   :  { %v2881_v31 = vpop.eup %2880 }
0x238d   :  { %1926 = vrot.lane.b32.xlu0 %v2881_v31, %s3081_s3 }
0x23ff   :  { %v1927_v32 = vpop.permute.xlu0 %1926 }
0x2400   :  { %v1929_v33 = vmul.f32 %v1927_v32, %v1912_v27 }
0x2402   :  { %1932 = vrot.lane.b32.xlu1 %v1929_v33, %s3082_s22 }
0x2474   :  { %v1933_v34 = vpop.permute.xlu1 %1932 }
0x2475   :  { %2721 = vmatmul.mubr.msk.f32.vlgmr.msra.gmra.mxu1 %vm288_vm4, %v1933_v34 }
0x2476   :  { %2742 = vmatprep.mubr.msk.f32.mxu1 %vm3080_vm0, %v3079_v0  ;;  %2735 = vmatpush3.msra.mxu1 %v2137_v12 }
0x2477   :  { %2736 = vmatprep.subr.mxu1 %v3079_v0 }
0x2478   :  { %2737 = vmatpush3.msra.mxu1 %v2136_v13 }
0x2479   :  { %2738 = vmatprep.subr.mxu1 %v3079_v0 }
0x247a   :  { %2739 = vmatpush3.msra.mxu1 %v2135_v14 }
0x247b   :  { %2740 = vmatprep.subr.mxu1 %v3079_v0 }
0x247c   :  { %2741 = vmatpush3.msra.mxu1 %v2134_v35 }
0x2535   :  { %v2002_v37 = vpop.f32.mrf.mxu1 }
0x2536   :  { %v2006_v38 = vadd.f32 %v2002_v37, %v1303_v36 }
0x2537   :  { %v2722_v39 = vpop.f32.mrf.mxu1 }
0x2538   :  { %v2361_v40 = vmul.f32 -1.442695, %v2006_v38 }
0x253a   :  { %2882 = vpow2.f32 %v2361_v40 }
0x253b   :  { %2884 = vtanh.f32 %v2006_v38 }
0x2547   :  { %v2883_v41 = vpop.eup %2882 }
0x2548   :  { %v2011_v42 = vadd.f32 1.0, %v2883_v41  ;;  %v2885_v43 = vpop.eup %2884 }
0x254a   :  { %2886 = vrcp.f32 %v2011_v42 }
0x2557   :  { %v2887_v44 = vpop.eup %2886 }
0x2558   :  { %v2014_v45 = vsel %vm3231_vm3, %v2885_v43, %v2887_v44 }
0x2559   :  { %2017 = vrot.lane.b32.xlu0 %v2014_v45, %s3081_s3  ;;  %v2015_v21 = vmul.f32 %v2014_v45, %v1923_v30 }
0x25cb   :  { %v2018_v46 = vpop.permute.xlu0 %2017 }
0x25cc   :  { %v2020_v47 = vmul.f32 %v2018_v46, %v2014_v45 }
0x25ce   :  { %2022 = vrot.lane.b32.xlu1 %v2020_v47, %s3082_s22 }
0x2640   :  { %v2023_v48 = vpop.permute.xlu1 %2022 }
0x2641   :  { %v2025_v49 = vadd.f32 %v2023_v48, %v2015_v21 }
0x2643   :  { %2888 = vtanh.f32 %v2025_v49 }
0x2650   :  { %v2889_v50 = vpop.eup %2888 }
0x2651   :  { %2028 = vrot.lane.b32.xlu0 %v2889_v50, %s3081_s3 }
0x26c3   :  { %v2029_v51 = vpop.permute.xlu0 %2028 }
0x26c4   :  { %v2031_v52 = vmul.f32 %v2029_v51, %v2014_v45 }
0x26c6   :  { %2034 = vrot.lane.b32.xlu1 %v2031_v52, %s3082_s22 }
0x2738   :  { %v2035_v53 = vpop.permute.xlu1 %2034 }
0x2739   :  { %2732 = vmatmul.mubr.msk.f32.vlgmr.msra.gmra.mxu0 %vm288_vm4, %v2035_v53 }
0x273a   :  { %2753 = vmatprep.mubr.msk.f32.mxu0 %vm3080_vm0, %v3079_v0  ;;  %2746 = vmatpush3.msra.mxu0 %v2224_v23 }
0x273b   :  { %2747 = vmatprep.subr.mxu0 %v3079_v0 }
0x273c   :  { %2748 = vmatpush3.msra.mxu0 %v2223_v6 }
0x273d   :  { %2749 = vmatprep.subr.mxu0 %v3079_v0 }
0x273e   :  { %2750 = vmatpush3.msra.mxu0 %v2222_v63 }
0x273f   :  { %2751 = vmatprep.subr.mxu0 %v3079_v0 }
0x2740   :  { %2752 = vmatpush3.msra.mxu0 %v2221_v26 }
0x27f9   :  { %v2104_v55 = vpop.f32.mrf.mxu0 }
0x27fa   :  { %v2108_v56 = vadd.f32 %v2104_v55, %v1308_v54 }
0x27fb   :  { %v2733_v57 = vpop.f32.mrf.mxu0 }
0x27fc   :  { %v2363_v58 = vmul.f32 -1.442695, %v2108_v56 }
0x27fe   :  { %2890 = vpow2.f32 %v2363_v58 }
0x27ff   :  { %2892 = vtanh.f32 %v2108_v56 }
0x280b   :  { %v2891_v59 = vpop.eup %2890 }
0x280c   :  { %v2113_v60 = vadd.f32 1.0, %v2891_v59  ;;  %v2893_v61 = vpop.eup %2892 }
0x280e   :  { %2894 = vrcp.f32 %v2113_v60 }
0x281b   :  { %v2895_v62 = vpop.eup %2894 }
0x281c   :  { %v2116_v4 = vsel %vm3231_vm3, %v2893_v61, %v2895_v62 }
0x281d   :  { %2119 = vrot.lane.b32.xlu0 %v2116_v4, %s3081_s3  ;;  %v2117_v5 = vmul.f32 %v2116_v4, %v2025_v49 }
0x288f   :  { %v2120_v7 = vpop.permute.xlu0 %2119 }
0x2890   :  { %v2122_v8 = vmul.f32 %v2120_v7, %v2116_v4 }
0x2892   :  { %2124 = vrot.lane.b32.xlu1 %v2122_v8, %s3082_s22 }
0x2904   :  { %v2125_v20 = vpop.permute.xlu1 %2124 }
0x2905   :  { %v2127_v10 = vadd.f32 %v2125_v20, %v2117_v5 }
0x2907   :  { %2896 = vtanh.f32 %v2127_v10 }
0x2914   :  { %v2897_v15 = vpop.eup %2896 }
0x2915   :  { %2130 = vrot.lane.b32.xlu0 %v2897_v15, %s3081_s3 }
0x2987   :  { %v2131_v16 = vpop.permute.xlu0 %2130 }
0x2988   :  { %v2133_v19 = vmul.f32 %v2131_v16, %v2116_v4 }
0x298a   :  { %2146 = vrot.lane.b32.xlu1 %v2133_v19, %s3082_s22 }
0x29fc   :  { %v2147_v22 = vpop.permute.xlu1 %2146 }
0x29fd   :  { %2743 = vmatmul.mubr.msk.f32.vlgmr.msra.gmra.mxu1 %vm288_vm4, %v2147_v22 }
0x2abd   :  { %v2216_v24 = vpop.f32.mrf.mxu1 }
0x2abe   :  { %v2217_v9 = vadd.f32 %v2364_v18, %v2216_v24 }
0x2abf   :  { %v2744_v25 = vpop.f32.mrf.mxu1 }
0x2ac0   :  { %2898 = vtanh.f32 %v2217_v9 }
0x2acd   :  { %v2899_v1 = vpop.eup %2898 }
0x2ace   :  { %2754 = vmatmul.mubr.msk.f32.vlgmr.msra.gmra.mxu0 %vm288_vm4, %v2899_v1 }
0x2b8e   :  { %v2301_v2 = vpop.f32.mrf.mxu0 }
0x2b8f   :  { %v2302_v0 = vadd.f32 %v2366_v11, %v2301_v2 }
0x2b90   :  { %v2755_v27 = vpop.f32.mrf.mxu0 }
0x2b91   :  { %2305 = vst [vmem:[#allocation16] sm:$0xff] %v2302_v0 }
0x2b92   :  { %3051 = shalt.err (!%p3048_p11)
}
0x2b93   :  { %2315 = dma.vmem_to_hbm [thread:$0]  %s2313_s16, 128, %s3576_s11, [#allocation6]  }
0x2b94   :  { %3068 = dma.done.wait [#allocation6], 128  }
0x2b95   :  { %3069 = vsyncadd [#allocation6], 4294967168 }
0x2b96   :  { %2319 = vsyncpa [#allocation5], 1 }
0x2b97   :  { %2320 = vsyncpa [#allocation8], 1 }
0x2b98   :  { %2321 = vsyncpa [#allocation11], 1 }
0x2b99   :  { %2322 = vsyncpa [#allocation14], 1 }
0x2b9a   :  { %2323 = vsyncpa [#allocation6], 1 }

</bundles_post_ra>
